<compile_context>
chip_gen: v5e
topology: v5e:2x2
jax: 0.10.0
libtpu: 0.0.40
codegen_flags: <defaults>
</compile_context>

<pallas_src>
import jax
import jax.numpy as jnp
import numpy as np
from jax.experimental import pallas as pl
from jax.experimental.pallas import tpu as pltpu

N, C, H, W, K = 2, 4, 16, 16, 3
EPS = 1e-5                       # nn.InstanceNorm2d default eps
ROWS = N * C                     # 8 sublanes: (n, c)
LANES = H * W                    # 256 lanes : (h, w)


def _roll_lanes(a, k):
    """out[:, i] = a[:, (i - k) % LANES], static k.

    Implemented as concat of two static lane slices so the semantics do not
    depend on any rotate-op sign convention."""
    k = k % LANES
    if k == 0:
        return a
    return jnp.concatenate([a[:, LANES - k:], a[:, :LANES - k]], axis=1)


def _resblock_kernel(x_ref, w_ref, aff_ref, o_ref):
    # x_ref  : (8, 256) f32  rows=(n,c), lanes=(h,w)  -- whole batch, 2 vregs
    # w_ref  : (2, 9, 8, 4) f32  [conv, tap=ky*3+kx, row=(n,ic), oc]
    # aff_ref: (2, 8, 2)    f32  [conv, row=(n,c), {gamma, beta}]
    # o_ref  : (8, 256) f32
    x = x_ref[...]

    lane = jax.lax.broadcasted_iota(jnp.int32, (ROWS, LANES), 1)
    w_in_row = jnp.bitwise_and(lane, W - 1)          # w coordinate inside a row
    m_w0, m_wL = w_in_row == 0, w_in_row == W - 1
    m_h0, m_hL = lane < W, lane >= LANES - W         # h == 0 / h == H-1

    def shifted_taps(a):
        # taps[(dy,dx)][r, h*W+w] = a_reflect[r, h+dy, w+dx]  (reflection pad 1).
        # Lane rolls wrap only inside the same (n,c) plane; every wrapped or
        # group-crossing lane is exactly a boundary lane replaced by the
        # reflection fix below.
        up, down = _roll_lanes(a, -W), _roll_lanes(a, W)     # h+1 / h-1
        rows = {
            -1: jnp.where(m_h0, up, down),    # h-1; h=0  reflects to h=1
            0: a,
            1: jnp.where(m_hL, down, up),     # h+1; h=15 reflects to h=14
        }
        taps = {}
        for dy, b in rows.items():
            left, right = _roll_lanes(b, 1), _roll_lanes(b, -1)  # w-1 / w+1
            taps[(dy, -1)] = jnp.where(m_w0, right, left)  # w=0  reflects to w=1
            taps[(dy, 0)] = b
            taps[(dy, 1)] = jnp.where(m_wL, left, right)   # w=15 reflects to w=14
        return taps

    def conv_in(a, conv, relu):
        # 3x3 reflect-pad conv + InstanceNorm(affine) (+ ReLU), all on the
        # packed (8,256) layout.  Conv bias omitted: a per-channel bias added
        # right before IN cancels exactly under the mean subtraction (IN
        # follows the conv directly -- keep it that way).
        taps = shifted_taps(a)
        accs = [None] * C                              # per-oc accumulators
        for ky in range(K):
            for kx in range(K):
                t = taps[(ky - 1, kx - 1)]
                wtap = w_ref[conv, ky * K + kx]        # (8, 4): row=(n,ic), col=oc
                for oc in range(C):
                    term = wtap[:, oc:oc + 1] * t      # weight bcast over 256 lanes
                    accs[oc] = term if accs[oc] is None else accs[oc] + term
        # ic-sum: rows (n, ic) of accs[oc] -> output row (n, oc)
        rows = []
        for n in range(N):
            for oc in range(C):
                rows.append(jnp.sum(accs[oc][n * C:(n + 1) * C, :],
                                    axis=0, keepdims=True))
        y = jnp.concatenate(rows, axis=0)              # (8, 256), rows = (n, oc)
        # InstanceNorm: per-row stats over exactly the H*W = 256 real lanes.
        mean = jnp.mean(y, axis=1, keepdims=True)      # (8, 1)
        cen = y - mean
        var = jnp.mean(cen * cen, axis=1, keepdims=True)
        aff = aff_ref[conv]                            # (8, 2)
        y = cen * (jax.lax.rsqrt(var + EPS) * aff[:, 0:1]) + aff[:, 1:2]
        if relu:
            y = jnp.maximum(y, 0.0)
        return y

    h1 = conv_in(x, 0, relu=True)
    h2 = conv_in(h1, 1, relu=False)
    o_ref[...] = x * 0.2 + h2                          # residual: x*0.2 + block(x)


def resblock_forward(x, w1, w2, gamma1, beta1, gamma2, beta2):
    """x: (N, C, H, W) float32.  Conv biases are omitted (cancelled by IN)."""
    x = x.astype(jnp.float32)
    assert x.shape == (N, C, H, W)

    def wcols(w):
        # (OC, IC, K, K) -> (9, 8, 4): [tap, row=(n,ic), oc], tiled over n.
        wt = jnp.transpose(w.reshape(C, C, K * K), (2, 1, 0))   # (tap, ic, oc)
        return jnp.tile(wt, (1, N, 1))

    w_packed = jnp.stack([wcols(w1), wcols(w2)], axis=0).astype(jnp.float32)  # (2,9,8,4)
    aff = jnp.stack([
        jnp.stack([jnp.tile(gamma1, N), jnp.tile(beta1, N)], axis=1),
        jnp.stack([jnp.tile(gamma2, N), jnp.tile(beta2, N)], axis=1),
    ], axis=0).astype(jnp.float32)                                            # (2,8,2)

    out = pl.pallas_call(
        _resblock_kernel,
        out_shape=jax.ShapeDtypeStruct((ROWS, LANES), jnp.float32),
        grid=(1,),
        in_specs=[
            pl.BlockSpec((ROWS, LANES), lambda i: (0, 0)),
            pl.BlockSpec((2, K * K, ROWS, C), lambda i: (0, 0, 0, 0)),
            pl.BlockSpec((2, ROWS, 2), lambda i: (0, 0, 0)),
        ],
        out_specs=pl.BlockSpec((ROWS, LANES), lambda i: (0, 0)),
        compiler_params=pltpu.CompilerParams(
            dimension_semantics=("arbitrary",)),
    )(x.reshape(ROWS, LANES), w_packed, aff)
    return out.reshape(N, C, H, W)


def _reference(x, w1, b1, gamma1, beta1, w2, b2, gamma2, beta2):
    """Pure-JAX reference mirroring the PyTorch ResBlock (with conv biases)."""
    def refpad(t):
        return jnp.pad(t, ((0, 0), (0, 0), (1, 1), (1, 1)), mode="reflect")

    def conv(t, w, b):
        y = jax.lax.conv_general_dilated(
            t, w, window_strides=(1, 1), padding="VALID",
            dimension_numbers=("NCHW", "OIHW", "NCHW"))
        return y + b.reshape(1, -1, 1, 1)

    def inorm(t, g, be):
        m = jnp.mean(t, axis=(2, 3), keepdims=True)
        v = jnp.mean((t - m) ** 2, axis=(2, 3), keepdims=True)
        t = (t - m) / jnp.sqrt(v + EPS)
        return t * g.reshape(1, -1, 1, 1) + be.reshape(1, -1, 1, 1)

    h = jnp.maximum(inorm(conv(refpad(x), w1, b1), gamma1, beta1), 0.0)
    h = inorm(conv(refpad(h), w2, b2), gamma2, beta2)
    return x * 0.2 + h


if __name__ == "__main__":
    key = jax.random.PRNGKey(0)
    ks = jax.random.split(key, 9)

    x = jax.random.normal(ks[0], (N, C, H, W), dtype=jnp.float32)

    fan_in = C * K * K
    bound = 1.0 / np.sqrt(fan_in)
    w1 = jax.random.uniform(ks[1], (C, C, K, K), jnp.float32, -bound, bound)
    b1 = jax.random.uniform(ks[2], (C,), jnp.float32, -bound, bound)
    w2 = jax.random.uniform(ks[3], (C, C, K, K), jnp.float32, -bound, bound)
    b2 = jax.random.uniform(ks[4], (C,), jnp.float32, -bound, bound)
    gamma1 = jax.random.uniform(ks[5], (C,), jnp.float32, 0.5, 1.5)
    beta1 = jax.random.uniform(ks[6], (C,), jnp.float32, -0.5, 0.5)
    gamma2 = jax.random.uniform(ks[7], (C,), jnp.float32, 0.5, 1.5)
    beta2 = jax.random.uniform(ks[8], (C,), jnp.float32, -0.5, 0.5)

    # Conv biases are intentionally NOT passed to the kernel: a bias added
    # right before InstanceNorm cancels exactly under the mean subtraction.
    out = jax.block_until_ready(
        resblock_forward(x, w1, w2, gamma1, beta1, gamma2, beta2))
    ref = jax.block_until_ready(
        _reference(x, w1, b1, gamma1, beta1, w2, b2, gamma2, beta2))
    np.testing.assert_allclose(np.asarray(out), np.asarray(ref),
                               atol=1e-4, rtol=1e-4)

    print("KERNEL_OK")
</pallas_src>

<mosaic_0001>
module attributes {stable_mosaic.version = 11 : i64} {
  func.func @_resblock_kernel(%arg0: i32, %arg1: memref<8x256xf32, #tpu.memory_space<vmem>>, %arg2: memref<2x9x8x4xf32, #tpu.memory_space<vmem>>, %arg3: memref<2x8x2xf32, #tpu.memory_space<vmem>>, %arg4: memref<8x256xf32, #tpu.memory_space<vmem>>) attributes {dimension_semantics = [#tpu.dimension_semantics<arbitrary>], iteration_bounds = array<i64: 1>, scalar_prefetch = 0 : i64, scratch_operands = 0 : i64, tpu.core_type = #tpu.core_type<tc>, window_params = [{pipeline_mode = #tpu.pipeline_mode<synchronous>, transform_indices = @transform_0, window_bounds = array<i64: 8, 256>}, {pipeline_mode = #tpu.pipeline_mode<synchronous>, transform_indices = @transform_1, window_bounds = array<i64: 2, 9, 8, 4>}, {pipeline_mode = #tpu.pipeline_mode<synchronous>, transform_indices = @transform_2, window_bounds = array<i64: 2, 8, 2>}, {pipeline_mode = #tpu.pipeline_mode<synchronous>, transform_indices = @transform_3, window_bounds = array<i64: 8, 256>}]} {
    %c0 = arith.constant 0 : index
    %c0_0 = arith.constant 0 : index
    %0 = vector.load %arg1[%c0, %c0_0] : memref<8x256xf32, #tpu.memory_space<vmem>>, vector<8x256xf32>
    %1 = tpu.iota {dimensions = array<i32: 1>} : vector<8x256xi32>
    %c15_i32 = arith.constant 15 : i32
    %2 = vector.broadcast %c15_i32 : i32 to vector<8x256xi32>
    %3 = arith.andi %1, %2 : vector<8x256xi32>
    %c0_i32 = arith.constant 0 : i32
    %4 = vector.broadcast %c0_i32 : i32 to vector<8x256xi32>
    %5 = arith.cmpi eq, %3, %4 : vector<8x256xi32>
    %c15_i32_1 = arith.constant 15 : i32
    %6 = vector.broadcast %c15_i32_1 : i32 to vector<8x256xi32>
    %7 = arith.cmpi eq, %3, %6 : vector<8x256xi32>
    %c16_i32 = arith.constant 16 : i32
    %8 = vector.broadcast %c16_i32 : i32 to vector<8x256xi32>
    %9 = arith.cmpi slt, %1, %8 : vector<8x256xi32>
    %c240_i32 = arith.constant 240 : i32
    %10 = vector.broadcast %c240_i32 : i32 to vector<8x256xi32>
    %11 = arith.cmpi sge, %1, %10 : vector<8x256xi32>
    %12 = vector.extract_strided_slice %0 {offsets = [0, 16], sizes = [8, 240], strides = [1, 1]} : vector<8x256xf32> to vector<8x240xf32>
    %13 = vector.extract_strided_slice %0 {offsets = [0, 0], sizes = [8, 16], strides = [1, 1]} : vector<8x256xf32> to vector<8x16xf32>
    %14 = tpu.concatenate %12, %13 in 1 : vector<8x240xf32>, vector<8x16xf32> -> vector<8x256xf32>
    %15 = vector.extract_strided_slice %0 {offsets = [0, 240], sizes = [8, 16], strides = [1, 1]} : vector<8x256xf32> to vector<8x16xf32>
    %16 = vector.extract_strided_slice %0 {offsets = [0, 0], sizes = [8, 240], strides = [1, 1]} : vector<8x256xf32> to vector<8x240xf32>
    %17 = tpu.concatenate %15, %16 in 1 : vector<8x16xf32>, vector<8x240xf32> -> vector<8x256xf32>
    %18 = arith.select %9, %14, %17 : vector<8x256xi1>, vector<8x256xf32>
    %19 = arith.select %11, %17, %14 : vector<8x256xi1>, vector<8x256xf32>
    %20 = vector.extract_strided_slice %18 {offsets = [0, 255], sizes = [8, 1], strides = [1, 1]} : vector<8x256xf32> to vector<8x1xf32>
    %21 = vector.extract_strided_slice %18 {offsets = [0, 0], sizes = [8, 255], strides = [1, 1]} : vector<8x256xf32> to vector<8x255xf32>
    %22 = tpu.concatenate %20, %21 in 1 : vector<8x1xf32>, vector<8x255xf32> -> vector<8x256xf32>
    %23 = vector.extract_strided_slice %18 {offsets = [0, 1], sizes = [8, 255], strides = [1, 1]} : vector<8x256xf32> to vector<8x255xf32>
    %24 = vector.extract_strided_slice %18 {offsets = [0, 0], sizes = [8, 1], strides = [1, 1]} : vector<8x256xf32> to vector<8x1xf32>
    %25 = tpu.concatenate %23, %24 in 1 : vector<8x255xf32>, vector<8x1xf32> -> vector<8x256xf32>
    %26 = arith.select %5, %25, %22 : vector<8x256xi1>, vector<8x256xf32>
    %27 = arith.select %7, %22, %25 : vector<8x256xi1>, vector<8x256xf32>
    %28 = vector.extract_strided_slice %0 {offsets = [0, 255], sizes = [8, 1], strides = [1, 1]} : vector<8x256xf32> to vector<8x1xf32>
    %29 = vector.extract_strided_slice %0 {offsets = [0, 0], sizes = [8, 255], strides = [1, 1]} : vector<8x256xf32> to vector<8x255xf32>
    %30 = tpu.concatenate %28, %29 in 1 : vector<8x1xf32>, vector<8x255xf32> -> vector<8x256xf32>
    %31 = vector.extract_strided_slice %0 {offsets = [0, 1], sizes = [8, 255], strides = [1, 1]} : vector<8x256xf32> to vector<8x255xf32>
    %32 = vector.extract_strided_slice %0 {offsets = [0, 0], sizes = [8, 1], strides = [1, 1]} : vector<8x256xf32> to vector<8x1xf32>
    %33 = tpu.concatenate %31, %32 in 1 : vector<8x255xf32>, vector<8x1xf32> -> vector<8x256xf32>
    %34 = arith.select %5, %33, %30 : vector<8x256xi1>, vector<8x256xf32>
    %35 = arith.select %7, %30, %33 : vector<8x256xi1>, vector<8x256xf32>
    %36 = vector.extract_strided_slice %19 {offsets = [0, 255], sizes = [8, 1], strides = [1, 1]} : vector<8x256xf32> to vector<8x1xf32>
    %37 = vector.extract_strided_slice %19 {offsets = [0, 0], sizes = [8, 255], strides = [1, 1]} : vector<8x256xf32> to vector<8x255xf32>
    %38 = tpu.concatenate %36, %37 in 1 : vector<8x1xf32>, vector<8x255xf32> -> vector<8x256xf32>
    %39 = vector.extract_strided_slice %19 {offsets = [0, 1], sizes = [8, 255], strides = [1, 1]} : vector<8x256xf32> to vector<8x255xf32>
    %40 = vector.extract_strided_slice %19 {offsets = [0, 0], sizes = [8, 1], strides = [1, 1]} : vector<8x256xf32> to vector<8x1xf32>
    %41 = tpu.concatenate %39, %40 in 1 : vector<8x255xf32>, vector<8x1xf32> -> vector<8x256xf32>
    %42 = arith.select %5, %41, %38 : vector<8x256xi1>, vector<8x256xf32>
    %43 = arith.select %7, %38, %41 : vector<8x256xi1>, vector<8x256xf32>
    %c0_2 = arith.constant 0 : index
    %c0_3 = arith.constant 0 : index
    %c0_4 = arith.constant 0 : index
    %c0_5 = arith.constant 0 : index
    %44 = vector.load %arg2[%c0_2, %c0_3, %c0_4, %c0_5] : memref<2x9x8x4xf32, #tpu.memory_space<vmem>>, vector<1x1x8x4xf32>
    %45 = vector.shape_cast %44 : vector<1x1x8x4xf32> to vector<8x4xf32>
    %46 = vector.extract_strided_slice %45 {offsets = [0, 0], sizes = [8, 1], strides = [1, 1]} : vector<8x4xf32> to vector<8x1xf32>
    %47 = vector.broadcast %46 : vector<8x1xf32> to vector<8x256xf32>
    %48 = arith.mulf %47, %26 : vector<8x256xf32>
    %49 = vector.extract_strided_slice %45 {offsets = [0, 1], sizes = [8, 1], strides = [1, 1]} : vector<8x4xf32> to vector<8x1xf32>
    %50 = vector.broadcast %49 : vector<8x1xf32> to vector<8x256xf32>
    %51 = arith.mulf %50, %26 : vector<8x256xf32>
    %52 = vector.extract_strided_slice %45 {offsets = [0, 2], sizes = [8, 1], strides = [1, 1]} : vector<8x4xf32> to vector<8x1xf32>
    %53 = vector.broadcast %52 : vector<8x1xf32> to vector<8x256xf32>
    %54 = arith.mulf %53, %26 : vector<8x256xf32>
    %55 = vector.extract_strided_slice %45 {offsets = [0, 3], sizes = [8, 1], strides = [1, 1]} : vector<8x4xf32> to vector<8x1xf32>
    %56 = vector.broadcast %55 : vector<8x1xf32> to vector<8x256xf32>
    %57 = arith.mulf %56, %26 : vector<8x256xf32>
    %c0_6 = arith.constant 0 : index
    %c1 = arith.constant 1 : index
    %c0_7 = arith.constant 0 : index
    %c0_8 = arith.constant 0 : index
    %58 = vector.load %arg2[%c0_6, %c1, %c0_7, %c0_8] : memref<2x9x8x4xf32, #tpu.memory_space<vmem>>, vector<1x1x8x4xf32>
    %59 = vector.shape_cast %58 : vector<1x1x8x4xf32> to vector<8x4xf32>
    %60 = vector.extract_strided_slice %59 {offsets = [0, 0], sizes = [8, 1], strides = [1, 1]} : vector<8x4xf32> to vector<8x1xf32>
    %61 = vector.broadcast %60 : vector<8x1xf32> to vector<8x256xf32>
    %62 = arith.mulf %61, %18 : vector<8x256xf32>
    %63 = arith.addf %48, %62 : vector<8x256xf32>
    %64 = vector.extract_strided_slice %59 {offsets = [0, 1], sizes = [8, 1], strides = [1, 1]} : vector<8x4xf32> to vector<8x1xf32>
    %65 = vector.broadcast %64 : vector<8x1xf32> to vector<8x256xf32>
    %66 = arith.mulf %65, %18 : vector<8x256xf32>
    %67 = arith.addf %51, %66 : vector<8x256xf32>
    %68 = vector.extract_strided_slice %59 {offsets = [0, 2], sizes = [8, 1], strides = [1, 1]} : vector<8x4xf32> to vector<8x1xf32>
    %69 = vector.broadcast %68 : vector<8x1xf32> to vector<8x256xf32>
    %70 = arith.mulf %69, %18 : vector<8x256xf32>
    %71 = arith.addf %54, %70 : vector<8x256xf32>
    %72 = vector.extract_strided_slice %59 {offsets = [0, 3], sizes = [8, 1], strides = [1, 1]} : vector<8x4xf32> to vector<8x1xf32>
    %73 = vector.broadcast %72 : vector<8x1xf32> to vector<8x256xf32>
    %74 = arith.mulf %73, %18 : vector<8x256xf32>
    %75 = arith.addf %57, %74 : vector<8x256xf32>
    %c0_9 = arith.constant 0 : index
    %c2 = arith.constant 2 : index
    %c0_10 = arith.constant 0 : index
    %c0_11 = arith.constant 0 : index
    %76 = vector.load %arg2[%c0_9, %c2, %c0_10, %c0_11] : memref<2x9x8x4xf32, #tpu.memory_space<vmem>>, vector<1x1x8x4xf32>
    %77 = vector.shape_cast %76 : vector<1x1x8x4xf32> to vector<8x4xf32>
    %78 = vector.extract_strided_slice %77 {offsets = [0, 0], sizes = [8, 1], strides = [1, 1]} : vector<8x4xf32> to vector<8x1xf32>
    %79 = vector.broadcast %78 : vector<8x1xf32> to vector<8x256xf32>
    %80 = arith.mulf %79, %27 : vector<8x256xf32>
    %81 = arith.addf %63, %80 : vector<8x256xf32>
    %82 = vector.extract_strided_slice %77 {offsets = [0, 1], sizes = [8, 1], strides = [1, 1]} : vector<8x4xf32> to vector<8x1xf32>
    %83 = vector.broadcast %82 : vector<8x1xf32> to vector<8x256xf32>
    %84 = arith.mulf %83, %27 : vector<8x256xf32>
    %85 = arith.addf %67, %84 : vector<8x256xf32>
    %86 = vector.extract_strided_slice %77 {offsets = [0, 2], sizes = [8, 1], strides = [1, 1]} : vector<8x4xf32> to vector<8x1xf32>
    %87 = vector.broadcast %86 : vector<8x1xf32> to vector<8x256xf32>
    %88 = arith.mulf %87, %27 : vector<8x256xf32>
    %89 = arith.addf %71, %88 : vector<8x256xf32>
    %90 = vector.extract_strided_slice %77 {offsets = [0, 3], sizes = [8, 1], strides = [1, 1]} : vector<8x4xf32> to vector<8x1xf32>
    %91 = vector.broadcast %90 : vector<8x1xf32> to vector<8x256xf32>
    %92 = arith.mulf %91, %27 : vector<8x256xf32>
    %93 = arith.addf %75, %92 : vector<8x256xf32>
    %c0_12 = arith.constant 0 : index
    %c3 = arith.constant 3 : index
    %c0_13 = arith.constant 0 : index
    %c0_14 = arith.constant 0 : index
    %94 = vector.load %arg2[%c0_12, %c3, %c0_13, %c0_14] : memref<2x9x8x4xf32, #tpu.memory_space<vmem>>, vector<1x1x8x4xf32>
    %95 = vector.shape_cast %94 : vector<1x1x8x4xf32> to vector<8x4xf32>
    %96 = vector.extract_strided_slice %95 {offsets = [0, 0], sizes = [8, 1], strides = [1, 1]} : vector<8x4xf32> to vector<8x1xf32>
    %97 = vector.broadcast %96 : vector<8x1xf32> to vector<8x256xf32>
    %98 = arith.mulf %97, %34 : vector<8x256xf32>
    %99 = arith.addf %81, %98 : vector<8x256xf32>
    %100 = vector.extract_strided_slice %95 {offsets = [0, 1], sizes = [8, 1], strides = [1, 1]} : vector<8x4xf32> to vector<8x1xf32>
    %101 = vector.broadcast %100 : vector<8x1xf32> to vector<8x256xf32>
    %102 = arith.mulf %101, %34 : vector<8x256xf32>
    %103 = arith.addf %85, %102 : vector<8x256xf32>
    %104 = vector.extract_strided_slice %95 {offsets = [0, 2], sizes = [8, 1], strides = [1, 1]} : vector<8x4xf32> to vector<8x1xf32>
    %105 = vector.broadcast %104 : vector<8x1xf32> to vector<8x256xf32>
    %106 = arith.mulf %105, %34 : vector<8x256xf32>
    %107 = arith.addf %89, %106 : vector<8x256xf32>
    %108 = vector.extract_strided_slice %95 {offsets = [0, 3], sizes = [8, 1], strides = [1, 1]} : vector<8x4xf32> to vector<8x1xf32>
    %109 = vector.broadcast %108 : vector<8x1xf32> to vector<8x256xf32>
    %110 = arith.mulf %109, %34 : vector<8x256xf32>
    %111 = arith.addf %93, %110 : vector<8x256xf32>
    %c0_15 = arith.constant 0 : index
    %c4 = arith.constant 4 : index
    %c0_16 = arith.constant 0 : index
    %c0_17 = arith.constant 0 : index
    %112 = vector.load %arg2[%c0_15, %c4, %c0_16, %c0_17] : memref<2x9x8x4xf32, #tpu.memory_space<vmem>>, vector<1x1x8x4xf32>
    %113 = vector.shape_cast %112 : vector<1x1x8x4xf32> to vector<8x4xf32>
    %114 = vector.extract_strided_slice %113 {offsets = [0, 0], sizes = [8, 1], strides = [1, 1]} : vector<8x4xf32> to vector<8x1xf32>
    %115 = vector.broadcast %114 : vector<8x1xf32> to vector<8x256xf32>
    %116 = arith.mulf %115, %0 : vector<8x256xf32>
    %117 = arith.addf %99, %116 : vector<8x256xf32>
    %118 = vector.extract_strided_slice %113 {offsets = [0, 1], sizes = [8, 1], strides = [1, 1]} : vector<8x4xf32> to vector<8x1xf32>
    %119 = vector.broadcast %118 : vector<8x1xf32> to vector<8x256xf32>
    %120 = arith.mulf %119, %0 : vector<8x256xf32>
    %121 = arith.addf %103, %120 : vector<8x256xf32>
    %122 = vector.extract_strided_slice %113 {offsets = [0, 2], sizes = [8, 1], strides = [1, 1]} : vector<8x4xf32> to vector<8x1xf32>
    %123 = vector.broadcast %122 : vector<8x1xf32> to vector<8x256xf32>
    %124 = arith.mulf %123, %0 : vector<8x256xf32>
    %125 = arith.addf %107, %124 : vector<8x256xf32>
    %126 = vector.extract_strided_slice %113 {offsets = [0, 3], sizes = [8, 1], strides = [1, 1]} : vector<8x4xf32> to vector<8x1xf32>
    %127 = vector.broadcast %126 : vector<8x1xf32> to vector<8x256xf32>
    %128 = arith.mulf %127, %0 : vector<8x256xf32>
    %129 = arith.addf %111, %128 : vector<8x256xf32>
    %c0_18 = arith.constant 0 : index
    %c5 = arith.constant 5 : index
    %c0_19 = arith.constant 0 : index
    %c0_20 = arith.constant 0 : index
    %130 = vector.load %arg2[%c0_18, %c5, %c0_19, %c0_20] : memref<2x9x8x4xf32, #tpu.memory_space<vmem>>, vector<1x1x8x4xf32>
    %131 = vector.shape_cast %130 : vector<1x1x8x4xf32> to vector<8x4xf32>
    %132 = vector.extract_strided_slice %131 {offsets = [0, 0], sizes = [8, 1], strides = [1, 1]} : vector<8x4xf32> to vector<8x1xf32>
    %133 = vector.broadcast %132 : vector<8x1xf32> to vector<8x256xf32>
    %134 = arith.mulf %133, %35 : vector<8x256xf32>
    %135 = arith.addf %117, %134 : vector<8x256xf32>
    %136 = vector.extract_strided_slice %131 {offsets = [0, 1], sizes = [8, 1], strides = [1, 1]} : vector<8x4xf32> to vector<8x1xf32>
    %137 = vector.broadcast %136 : vector<8x1xf32> to vector<8x256xf32>
    %138 = arith.mulf %137, %35 : vector<8x256xf32>
    %139 = arith.addf %121, %138 : vector<8x256xf32>
    %140 = vector.extract_strided_slice %131 {offsets = [0, 2], sizes = [8, 1], strides = [1, 1]} : vector<8x4xf32> to vector<8x1xf32>
    %141 = vector.broadcast %140 : vector<8x1xf32> to vector<8x256xf32>
    %142 = arith.mulf %141, %35 : vector<8x256xf32>
    %143 = arith.addf %125, %142 : vector<8x256xf32>
    %144 = vector.extract_strided_slice %131 {offsets = [0, 3], sizes = [8, 1], strides = [1, 1]} : vector<8x4xf32> to vector<8x1xf32>
    %145 = vector.broadcast %144 : vector<8x1xf32> to vector<8x256xf32>
    %146 = arith.mulf %145, %35 : vector<8x256xf32>
    %147 = arith.addf %129, %146 : vector<8x256xf32>
    %c0_21 = arith.constant 0 : index
    %c6 = arith.constant 6 : index
    %c0_22 = arith.constant 0 : index
    %c0_23 = arith.constant 0 : index
    %148 = vector.load %arg2[%c0_21, %c6, %c0_22, %c0_23] : memref<2x9x8x4xf32, #tpu.memory_space<vmem>>, vector<1x1x8x4xf32>
    %149 = vector.shape_cast %148 : vector<1x1x8x4xf32> to vector<8x4xf32>
    %150 = vector.extract_strided_slice %149 {offsets = [0, 0], sizes = [8, 1], strides = [1, 1]} : vector<8x4xf32> to vector<8x1xf32>
    %151 = vector.broadcast %150 : vector<8x1xf32> to vector<8x256xf32>
    %152 = arith.mulf %151, %42 : vector<8x256xf32>
    %153 = arith.addf %135, %152 : vector<8x256xf32>
    %154 = vector.extract_strided_slice %149 {offsets = [0, 1], sizes = [8, 1], strides = [1, 1]} : vector<8x4xf32> to vector<8x1xf32>
    %155 = vector.broadcast %154 : vector<8x1xf32> to vector<8x256xf32>
    %156 = arith.mulf %155, %42 : vector<8x256xf32>
    %157 = arith.addf %139, %156 : vector<8x256xf32>
    %158 = vector.extract_strided_slice %149 {offsets = [0, 2], sizes = [8, 1], strides = [1, 1]} : vector<8x4xf32> to vector<8x1xf32>
    %159 = vector.broadcast %158 : vector<8x1xf32> to vector<8x256xf32>
    %160 = arith.mulf %159, %42 : vector<8x256xf32>
    %161 = arith.addf %143, %160 : vector<8x256xf32>
    %162 = vector.extract_strided_slice %149 {offsets = [0, 3], sizes = [8, 1], strides = [1, 1]} : vector<8x4xf32> to vector<8x1xf32>
    %163 = vector.broadcast %162 : vector<8x1xf32> to vector<8x256xf32>
    %164 = arith.mulf %163, %42 : vector<8x256xf32>
    %165 = arith.addf %147, %164 : vector<8x256xf32>
    %c0_24 = arith.constant 0 : index
    %c7 = arith.constant 7 : index
    %c0_25 = arith.constant 0 : index
    %c0_26 = arith.constant 0 : index
    %166 = vector.load %arg2[%c0_24, %c7, %c0_25, %c0_26] : memref<2x9x8x4xf32, #tpu.memory_space<vmem>>, vector<1x1x8x4xf32>
    %167 = vector.shape_cast %166 : vector<1x1x8x4xf32> to vector<8x4xf32>
    %168 = vector.extract_strided_slice %167 {offsets = [0, 0], sizes = [8, 1], strides = [1, 1]} : vector<8x4xf32> to vector<8x1xf32>
    %169 = vector.broadcast %168 : vector<8x1xf32> to vector<8x256xf32>
    %170 = arith.mulf %169, %19 : vector<8x256xf32>
    %171 = arith.addf %153, %170 : vector<8x256xf32>
    %172 = vector.extract_strided_slice %167 {offsets = [0, 1], sizes = [8, 1], strides = [1, 1]} : vector<8x4xf32> to vector<8x1xf32>
    %173 = vector.broadcast %172 : vector<8x1xf32> to vector<8x256xf32>
    %174 = arith.mulf %173, %19 : vector<8x256xf32>
    %175 = arith.addf %157, %174 : vector<8x256xf32>
    %176 = vector.extract_strided_slice %167 {offsets = [0, 2], sizes = [8, 1], strides = [1, 1]} : vector<8x4xf32> to vector<8x1xf32>
    %177 = vector.broadcast %176 : vector<8x1xf32> to vector<8x256xf32>
    %178 = arith.mulf %177, %19 : vector<8x256xf32>
    %179 = arith.addf %161, %178 : vector<8x256xf32>
    %180 = vector.extract_strided_slice %167 {offsets = [0, 3], sizes = [8, 1], strides = [1, 1]} : vector<8x4xf32> to vector<8x1xf32>
    %181 = vector.broadcast %180 : vector<8x1xf32> to vector<8x256xf32>
    %182 = arith.mulf %181, %19 : vector<8x256xf32>
    %183 = arith.addf %165, %182 : vector<8x256xf32>
    %c0_27 = arith.constant 0 : index
    %c8 = arith.constant 8 : index
    %c0_28 = arith.constant 0 : index
    %c0_29 = arith.constant 0 : index
    %184 = vector.load %arg2[%c0_27, %c8, %c0_28, %c0_29] : memref<2x9x8x4xf32, #tpu.memory_space<vmem>>, vector<1x1x8x4xf32>
    %185 = vector.shape_cast %184 : vector<1x1x8x4xf32> to vector<8x4xf32>
    %186 = vector.extract_strided_slice %185 {offsets = [0, 0], sizes = [8, 1], strides = [1, 1]} : vector<8x4xf32> to vector<8x1xf32>
    %187 = vector.broadcast %186 : vector<8x1xf32> to vector<8x256xf32>
    %188 = arith.mulf %187, %43 : vector<8x256xf32>
    %189 = arith.addf %171, %188 : vector<8x256xf32>
    %190 = vector.extract_strided_slice %185 {offsets = [0, 1], sizes = [8, 1], strides = [1, 1]} : vector<8x4xf32> to vector<8x1xf32>
    %191 = vector.broadcast %190 : vector<8x1xf32> to vector<8x256xf32>
    %192 = arith.mulf %191, %43 : vector<8x256xf32>
    %193 = arith.addf %175, %192 : vector<8x256xf32>
    %194 = vector.extract_strided_slice %185 {offsets = [0, 2], sizes = [8, 1], strides = [1, 1]} : vector<8x4xf32> to vector<8x1xf32>
    %195 = vector.broadcast %194 : vector<8x1xf32> to vector<8x256xf32>
    %196 = arith.mulf %195, %43 : vector<8x256xf32>
    %197 = arith.addf %179, %196 : vector<8x256xf32>
    %198 = vector.extract_strided_slice %185 {offsets = [0, 3], sizes = [8, 1], strides = [1, 1]} : vector<8x4xf32> to vector<8x1xf32>
    %199 = vector.broadcast %198 : vector<8x1xf32> to vector<8x256xf32>
    %200 = arith.mulf %199, %43 : vector<8x256xf32>
    %201 = arith.addf %183, %200 : vector<8x256xf32>
    %202 = vector.extract_strided_slice %189 {offsets = [0, 0], sizes = [4, 256], strides = [1, 1]} : vector<8x256xf32> to vector<4x256xf32>
    %cst = arith.constant dense<0.000000e+00> : vector<256xf32>
    %203 = vector.multi_reduction <add>, %202, %cst [0] : vector<4x256xf32> to vector<256xf32>
    %204 = vector.shape_cast %203 : vector<256xf32> to vector<1x256xf32>
    %205 = vector.extract_strided_slice %193 {offsets = [0, 0], sizes = [4, 256], strides = [1, 1]} : vector<8x256xf32> to vector<4x256xf32>
    %cst_30 = arith.constant dense<0.000000e+00> : vector<256xf32>
    %206 = vector.multi_reduction <add>, %205, %cst_30 [0] : vector<4x256xf32> to vector<256xf32>
    %207 = vector.shape_cast %206 : vector<256xf32> to vector<1x256xf32>
    %208 = vector.extract_strided_slice %197 {offsets = [0, 0], sizes = [4, 256], strides = [1, 1]} : vector<8x256xf32> to vector<4x256xf32>
    %cst_31 = arith.constant dense<0.000000e+00> : vector<256xf32>
    %209 = vector.multi_reduction <add>, %208, %cst_31 [0] : vector<4x256xf32> to vector<256xf32>
    %210 = vector.shape_cast %209 : vector<256xf32> to vector<1x256xf32>
    %211 = vector.extract_strided_slice %201 {offsets = [0, 0], sizes = [4, 256], strides = [1, 1]} : vector<8x256xf32> to vector<4x256xf32>
    %cst_32 = arith.constant dense<0.000000e+00> : vector<256xf32>
    %212 = vector.multi_reduction <add>, %211, %cst_32 [0] : vector<4x256xf32> to vector<256xf32>
    %213 = vector.shape_cast %212 : vector<256xf32> to vector<1x256xf32>
    %214 = vector.extract_strided_slice %189 {offsets = [4, 0], sizes = [4, 256], strides = [1, 1]} : vector<8x256xf32> to vector<4x256xf32>
    %cst_33 = arith.constant dense<0.000000e+00> : vector<256xf32>
    %215 = vector.multi_reduction <add>, %214, %cst_33 [0] : vector<4x256xf32> to vector<256xf32>
    %216 = vector.shape_cast %215 : vector<256xf32> to vector<1x256xf32>
    %217 = vector.extract_strided_slice %193 {offsets = [4, 0], sizes = [4, 256], strides = [1, 1]} : vector<8x256xf32> to vector<4x256xf32>
    %cst_34 = arith.constant dense<0.000000e+00> : vector<256xf32>
    %218 = vector.multi_reduction <add>, %217, %cst_34 [0] : vector<4x256xf32> to vector<256xf32>
    %219 = vector.shape_cast %218 : vector<256xf32> to vector<1x256xf32>
    %220 = vector.extract_strided_slice %197 {offsets = [4, 0], sizes = [4, 256], strides = [1, 1]} : vector<8x256xf32> to vector<4x256xf32>
    %cst_35 = arith.constant dense<0.000000e+00> : vector<256xf32>
    %221 = vector.multi_reduction <add>, %220, %cst_35 [0] : vector<4x256xf32> to vector<256xf32>
    %222 = vector.shape_cast %221 : vector<256xf32> to vector<1x256xf32>
    %223 = vector.extract_strided_slice %201 {offsets = [4, 0], sizes = [4, 256], strides = [1, 1]} : vector<8x256xf32> to vector<4x256xf32>
    %cst_36 = arith.constant dense<0.000000e+00> : vector<256xf32>
    %224 = vector.multi_reduction <add>, %223, %cst_36 [0] : vector<4x256xf32> to vector<256xf32>
    %225 = vector.shape_cast %224 : vector<256xf32> to vector<1x256xf32>
    %226 = tpu.concatenate %204, %207, %210, %213, %216, %219, %222, %225 in 0 : vector<1x256xf32>, vector<1x256xf32>, vector<1x256xf32>, vector<1x256xf32>, vector<1x256xf32>, vector<1x256xf32>, vector<1x256xf32>, vector<1x256xf32> -> vector<8x256xf32>
    %cst_37 = arith.constant dense<0.000000e+00> : vector<8xf32>
    %227 = vector.multi_reduction <add>, %226, %cst_37 [1] : vector<8x256xf32> to vector<8xf32>
    %228 = vector.shape_cast %227 : vector<8xf32> to vector<8x1xf32>
    %cst_38 = arith.constant 2.560000e+02 : f32
    %229 = vector.broadcast %cst_38 : f32 to vector<8x1xf32>
    %230 = arith.divf %228, %229 : vector<8x1xf32>
    %231 = vector.broadcast %230 : vector<8x1xf32> to vector<8x256xf32>
    %232 = arith.subf %226, %231 : vector<8x256xf32>
    %233 = arith.mulf %232, %232 : vector<8x256xf32>
    %cst_39 = arith.constant dense<0.000000e+00> : vector<8xf32>
    %234 = vector.multi_reduction <add>, %233, %cst_39 [1] : vector<8x256xf32> to vector<8xf32>
    %235 = vector.shape_cast %234 : vector<8xf32> to vector<8x1xf32>
    %cst_40 = arith.constant 2.560000e+02 : f32
    %236 = vector.broadcast %cst_40 : f32 to vector<8x1xf32>
    %237 = arith.divf %235, %236 : vector<8x1xf32>
    %c0_41 = arith.constant 0 : index
    %c0_42 = arith.constant 0 : index
    %c0_43 = arith.constant 0 : index
    %238 = vector.load %arg3[%c0_41, %c0_42, %c0_43] : memref<2x8x2xf32, #tpu.memory_space<vmem>>, vector<1x8x2xf32>
    %239 = vector.shape_cast %238 : vector<1x8x2xf32> to vector<8x2xf32>
    %cst_44 = arith.constant 9.99999974E-6 : f32
    %240 = vector.broadcast %cst_44 : f32 to vector<8x1xf32>
    %241 = arith.addf %237, %240 : vector<8x1xf32>
    %242 = math.rsqrt %241 : vector<8x1xf32>
    %243 = vector.extract_strided_slice %239 {offsets = [0, 0], sizes = [8, 1], strides = [1, 1]} : vector<8x2xf32> to vector<8x1xf32>
    %244 = arith.mulf %242, %243 : vector<8x1xf32>
    %245 = vector.broadcast %244 : vector<8x1xf32> to vector<8x256xf32>
    %246 = arith.mulf %232, %245 : vector<8x256xf32>
    %247 = vector.extract_strided_slice %239 {offsets = [0, 1], sizes = [8, 1], strides = [1, 1]} : vector<8x2xf32> to vector<8x1xf32>
    %248 = vector.broadcast %247 : vector<8x1xf32> to vector<8x256xf32>
    %249 = arith.addf %246, %248 : vector<8x256xf32>
    %cst_45 = arith.constant 0.000000e+00 : f32
    %250 = vector.broadcast %cst_45 : f32 to vector<8x256xf32>
    %251 = arith.maximumf %249, %250 : vector<8x256xf32>
    %252 = vector.extract_strided_slice %251 {offsets = [0, 16], sizes = [8, 240], strides = [1, 1]} : vector<8x256xf32> to vector<8x240xf32>
    %253 = vector.extract_strided_slice %251 {offsets = [0, 0], sizes = [8, 16], strides = [1, 1]} : vector<8x256xf32> to vector<8x16xf32>
    %254 = tpu.concatenate %252, %253 in 1 : vector<8x240xf32>, vector<8x16xf32> -> vector<8x256xf32>
    %255 = vector.extract_strided_slice %251 {offsets = [0, 240], sizes = [8, 16], strides = [1, 1]} : vector<8x256xf32> to vector<8x16xf32>
    %256 = vector.extract_strided_slice %251 {offsets = [0, 0], sizes = [8, 240], strides = [1, 1]} : vector<8x256xf32> to vector<8x240xf32>
    %257 = tpu.concatenate %255, %256 in 1 : vector<8x16xf32>, vector<8x240xf32> -> vector<8x256xf32>
    %258 = arith.select %9, %254, %257 : vector<8x256xi1>, vector<8x256xf32>
    %259 = arith.select %11, %257, %254 : vector<8x256xi1>, vector<8x256xf32>
    %260 = vector.extract_strided_slice %258 {offsets = [0, 255], sizes = [8, 1], strides = [1, 1]} : vector<8x256xf32> to vector<8x1xf32>
    %261 = vector.extract_strided_slice %258 {offsets = [0, 0], sizes = [8, 255], strides = [1, 1]} : vector<8x256xf32> to vector<8x255xf32>
    %262 = tpu.concatenate %260, %261 in 1 : vector<8x1xf32>, vector<8x255xf32> -> vector<8x256xf32>
    %263 = vector.extract_strided_slice %258 {offsets = [0, 1], sizes = [8, 255], strides = [1, 1]} : vector<8x256xf32> to vector<8x255xf32>
    %264 = vector.extract_strided_slice %258 {offsets = [0, 0], sizes = [8, 1], strides = [1, 1]} : vector<8x256xf32> to vector<8x1xf32>
    %265 = tpu.concatenate %263, %264 in 1 : vector<8x255xf32>, vector<8x1xf32> -> vector<8x256xf32>
    %266 = arith.select %5, %265, %262 : vector<8x256xi1>, vector<8x256xf32>
    %267 = arith.select %7, %262, %265 : vector<8x256xi1>, vector<8x256xf32>
    %268 = vector.extract_strided_slice %251 {offsets = [0, 255], sizes = [8, 1], strides = [1, 1]} : vector<8x256xf32> to vector<8x1xf32>
    %269 = vector.extract_strided_slice %251 {offsets = [0, 0], sizes = [8, 255], strides = [1, 1]} : vector<8x256xf32> to vector<8x255xf32>
    %270 = tpu.concatenate %268, %269 in 1 : vector<8x1xf32>, vector<8x255xf32> -> vector<8x256xf32>
    %271 = vector.extract_strided_slice %251 {offsets = [0, 1], sizes = [8, 255], strides = [1, 1]} : vector<8x256xf32> to vector<8x255xf32>
    %272 = vector.extract_strided_slice %251 {offsets = [0, 0], sizes = [8, 1], strides = [1, 1]} : vector<8x256xf32> to vector<8x1xf32>
    %273 = tpu.concatenate %271, %272 in 1 : vector<8x255xf32>, vector<8x1xf32> -> vector<8x256xf32>
    %274 = arith.select %5, %273, %270 : vector<8x256xi1>, vector<8x256xf32>
    %275 = arith.select %7, %270, %273 : vector<8x256xi1>, vector<8x256xf32>
    %276 = vector.extract_strided_slice %259 {offsets = [0, 255], sizes = [8, 1], strides = [1, 1]} : vector<8x256xf32> to vector<8x1xf32>
    %277 = vector.extract_strided_slice %259 {offsets = [0, 0], sizes = [8, 255], strides = [1, 1]} : vector<8x256xf32> to vector<8x255xf32>
    %278 = tpu.concatenate %276, %277 in 1 : vector<8x1xf32>, vector<8x255xf32> -> vector<8x256xf32>
    %279 = vector.extract_strided_slice %259 {offsets = [0, 1], sizes = [8, 255], strides = [1, 1]} : vector<8x256xf32> to vector<8x255xf32>
    %280 = vector.extract_strided_slice %259 {offsets = [0, 0], sizes = [8, 1], strides = [1, 1]} : vector<8x256xf32> to vector<8x1xf32>
    %281 = tpu.concatenate %279, %280 in 1 : vector<8x255xf32>, vector<8x1xf32> -> vector<8x256xf32>
    %282 = arith.select %5, %281, %278 : vector<8x256xi1>, vector<8x256xf32>
    %283 = arith.select %7, %278, %281 : vector<8x256xi1>, vector<8x256xf32>
    %c1_46 = arith.constant 1 : index
    %c0_47 = arith.constant 0 : index
    %c0_48 = arith.constant 0 : index
    %c0_49 = arith.constant 0 : index
    %284 = vector.load %arg2[%c1_46, %c0_47, %c0_48, %c0_49] : memref<2x9x8x4xf32, #tpu.memory_space<vmem>>, vector<1x1x8x4xf32>
    %285 = vector.shape_cast %284 : vector<1x1x8x4xf32> to vector<8x4xf32>
    %286 = vector.extract_strided_slice %285 {offsets = [0, 0], sizes = [8, 1], strides = [1, 1]} : vector<8x4xf32> to vector<8x1xf32>
    %287 = vector.broadcast %286 : vector<8x1xf32> to vector<8x256xf32>
    %288 = arith.mulf %287, %266 : vector<8x256xf32>
    %289 = vector.extract_strided_slice %285 {offsets = [0, 1], sizes = [8, 1], strides = [1, 1]} : vector<8x4xf32> to vector<8x1xf32>
    %290 = vector.broadcast %289 : vector<8x1xf32> to vector<8x256xf32>
    %291 = arith.mulf %290, %266 : vector<8x256xf32>
    %292 = vector.extract_strided_slice %285 {offsets = [0, 2], sizes = [8, 1], strides = [1, 1]} : vector<8x4xf32> to vector<8x1xf32>
    %293 = vector.broadcast %292 : vector<8x1xf32> to vector<8x256xf32>
    %294 = arith.mulf %293, %266 : vector<8x256xf32>
    %295 = vector.extract_strided_slice %285 {offsets = [0, 3], sizes = [8, 1], strides = [1, 1]} : vector<8x4xf32> to vector<8x1xf32>
    %296 = vector.broadcast %295 : vector<8x1xf32> to vector<8x256xf32>
    %297 = arith.mulf %296, %266 : vector<8x256xf32>
    %c1_50 = arith.constant 1 : index
    %c1_51 = arith.constant 1 : index
    %c0_52 = arith.constant 0 : index
    %c0_53 = arith.constant 0 : index
    %298 = vector.load %arg2[%c1_50, %c1_51, %c0_52, %c0_53] : memref<2x9x8x4xf32, #tpu.memory_space<vmem>>, vector<1x1x8x4xf32>
    %299 = vector.shape_cast %298 : vector<1x1x8x4xf32> to vector<8x4xf32>
    %300 = vector.extract_strided_slice %299 {offsets = [0, 0], sizes = [8, 1], strides = [1, 1]} : vector<8x4xf32> to vector<8x1xf32>
    %301 = vector.broadcast %300 : vector<8x1xf32> to vector<8x256xf32>
    %302 = arith.mulf %301, %258 : vector<8x256xf32>
    %303 = arith.addf %288, %302 : vector<8x256xf32>
    %304 = vector.extract_strided_slice %299 {offsets = [0, 1], sizes = [8, 1], strides = [1, 1]} : vector<8x4xf32> to vector<8x1xf32>
    %305 = vector.broadcast %304 : vector<8x1xf32> to vector<8x256xf32>
    %306 = arith.mulf %305, %258 : vector<8x256xf32>
    %307 = arith.addf %291, %306 : vector<8x256xf32>
    %308 = vector.extract_strided_slice %299 {offsets = [0, 2], sizes = [8, 1], strides = [1, 1]} : vector<8x4xf32> to vector<8x1xf32>
    %309 = vector.broadcast %308 : vector<8x1xf32> to vector<8x256xf32>
    %310 = arith.mulf %309, %258 : vector<8x256xf32>
    %311 = arith.addf %294, %310 : vector<8x256xf32>
    %312 = vector.extract_strided_slice %299 {offsets = [0, 3], sizes = [8, 1], strides = [1, 1]} : vector<8x4xf32> to vector<8x1xf32>
    %313 = vector.broadcast %312 : vector<8x1xf32> to vector<8x256xf32>
    %314 = arith.mulf %313, %258 : vector<8x256xf32>
    %315 = arith.addf %297, %314 : vector<8x256xf32>
    %c1_54 = arith.constant 1 : index
    %c2_55 = arith.constant 2 : index
    %c0_56 = arith.constant 0 : index
    %c0_57 = arith.constant 0 : index
    %316 = vector.load %arg2[%c1_54, %c2_55, %c0_56, %c0_57] : memref<2x9x8x4xf32, #tpu.memory_space<vmem>>, vector<1x1x8x4xf32>
    %317 = vector.shape_cast %316 : vector<1x1x8x4xf32> to vector<8x4xf32>
    %318 = vector.extract_strided_slice %317 {offsets = [0, 0], sizes = [8, 1], strides = [1, 1]} : vector<8x4xf32> to vector<8x1xf32>
    %319 = vector.broadcast %318 : vector<8x1xf32> to vector<8x256xf32>
    %320 = arith.mulf %319, %267 : vector<8x256xf32>
    %321 = arith.addf %303, %320 : vector<8x256xf32>
    %322 = vector.extract_strided_slice %317 {offsets = [0, 1], sizes = [8, 1], strides = [1, 1]} : vector<8x4xf32> to vector<8x1xf32>
    %323 = vector.broadcast %322 : vector<8x1xf32> to vector<8x256xf32>
    %324 = arith.mulf %323, %267 : vector<8x256xf32>
    %325 = arith.addf %307, %324 : vector<8x256xf32>
    %326 = vector.extract_strided_slice %317 {offsets = [0, 2], sizes = [8, 1], strides = [1, 1]} : vector<8x4xf32> to vector<8x1xf32>
    %327 = vector.broadcast %326 : vector<8x1xf32> to vector<8x256xf32>
    %328 = arith.mulf %327, %267 : vector<8x256xf32>
    %329 = arith.addf %311, %328 : vector<8x256xf32>
    %330 = vector.extract_strided_slice %317 {offsets = [0, 3], sizes = [8, 1], strides = [1, 1]} : vector<8x4xf32> to vector<8x1xf32>
    %331 = vector.broadcast %330 : vector<8x1xf32> to vector<8x256xf32>
    %332 = arith.mulf %331, %267 : vector<8x256xf32>
    %333 = arith.addf %315, %332 : vector<8x256xf32>
    %c1_58 = arith.constant 1 : index
    %c3_59 = arith.constant 3 : index
    %c0_60 = arith.constant 0 : index
    %c0_61 = arith.constant 0 : index
    %334 = vector.load %arg2[%c1_58, %c3_59, %c0_60, %c0_61] : memref<2x9x8x4xf32, #tpu.memory_space<vmem>>, vector<1x1x8x4xf32>
    %335 = vector.shape_cast %334 : vector<1x1x8x4xf32> to vector<8x4xf32>
    %336 = vector.extract_strided_slice %335 {offsets = [0, 0], sizes = [8, 1], strides = [1, 1]} : vector<8x4xf32> to vector<8x1xf32>
    %337 = vector.broadcast %336 : vector<8x1xf32> to vector<8x256xf32>
    %338 = arith.mulf %337, %274 : vector<8x256xf32>
    %339 = arith.addf %321, %338 : vector<8x256xf32>
    %340 = vector.extract_strided_slice %335 {offsets = [0, 1], sizes = [8, 1], strides = [1, 1]} : vector<8x4xf32> to vector<8x1xf32>
    %341 = vector.broadcast %340 : vector<8x1xf32> to vector<8x256xf32>
    %342 = arith.mulf %341, %274 : vector<8x256xf32>
    %343 = arith.addf %325, %342 : vector<8x256xf32>
    %344 = vector.extract_strided_slice %335 {offsets = [0, 2], sizes = [8, 1], strides = [1, 1]} : vector<8x4xf32> to vector<8x1xf32>
    %345 = vector.broadcast %344 : vector<8x1xf32> to vector<8x256xf32>
    %346 = arith.mulf %345, %274 : vector<8x256xf32>
    %347 = arith.addf %329, %346 : vector<8x256xf32>
    %348 = vector.extract_strided_slice %335 {offsets = [0, 3], sizes = [8, 1], strides = [1, 1]} : vector<8x4xf32> to vector<8x1xf32>
    %349 = vector.broadcast %348 : vector<8x1xf32> to vector<8x256xf32>
    %350 = arith.mulf %349, %274 : vector<8x256xf32>
    %351 = arith.addf %333, %350 : vector<8x256xf32>
    %c1_62 = arith.constant 1 : index
    %c4_63 = arith.constant 4 : index
    %c0_64 = arith.constant 0 : index
    %c0_65 = arith.constant 0 : index
    %352 = vector.load %arg2[%c1_62, %c4_63, %c0_64, %c0_65] : memref<2x9x8x4xf32, #tpu.memory_space<vmem>>, vector<1x1x8x4xf32>
    %353 = vector.shape_cast %352 : vector<1x1x8x4xf32> to vector<8x4xf32>
    %354 = vector.extract_strided_slice %353 {offsets = [0, 0], sizes = [8, 1], strides = [1, 1]} : vector<8x4xf32> to vector<8x1xf32>
    %355 = vector.broadcast %354 : vector<8x1xf32> to vector<8x256xf32>
    %356 = arith.mulf %355, %251 : vector<8x256xf32>
    %357 = arith.addf %339, %356 : vector<8x256xf32>
    %358 = vector.extract_strided_slice %353 {offsets = [0, 1], sizes = [8, 1], strides = [1, 1]} : vector<8x4xf32> to vector<8x1xf32>
    %359 = vector.broadcast %358 : vector<8x1xf32> to vector<8x256xf32>
    %360 = arith.mulf %359, %251 : vector<8x256xf32>
    %361 = arith.addf %343, %360 : vector<8x256xf32>
    %362 = vector.extract_strided_slice %353 {offsets = [0, 2], sizes = [8, 1], strides = [1, 1]} : vector<8x4xf32> to vector<8x1xf32>
    %363 = vector.broadcast %362 : vector<8x1xf32> to vector<8x256xf32>
    %364 = arith.mulf %363, %251 : vector<8x256xf32>
    %365 = arith.addf %347, %364 : vector<8x256xf32>
    %366 = vector.extract_strided_slice %353 {offsets = [0, 3], sizes = [8, 1], strides = [1, 1]} : vector<8x4xf32> to vector<8x1xf32>
    %367 = vector.broadcast %366 : vector<8x1xf32> to vector<8x256xf32>
    %368 = arith.mulf %367, %251 : vector<8x256xf32>
    %369 = arith.addf %351, %368 : vector<8x256xf32>
    %c1_66 = arith.constant 1 : index
    %c5_67 = arith.constant 5 : index
    %c0_68 = arith.constant 0 : index
    %c0_69 = arith.constant 0 : index
    %370 = vector.load %arg2[%c1_66, %c5_67, %c0_68, %c0_69] : memref<2x9x8x4xf32, #tpu.memory_space<vmem>>, vector<1x1x8x4xf32>
    %371 = vector.shape_cast %370 : vector<1x1x8x4xf32> to vector<8x4xf32>
    %372 = vector.extract_strided_slice %371 {offsets = [0, 0], sizes = [8, 1], strides = [1, 1]} : vector<8x4xf32> to vector<8x1xf32>
    %373 = vector.broadcast %372 : vector<8x1xf32> to vector<8x256xf32>
    %374 = arith.mulf %373, %275 : vector<8x256xf32>
    %375 = arith.addf %357, %374 : vector<8x256xf32>
    %376 = vector.extract_strided_slice %371 {offsets = [0, 1], sizes = [8, 1], strides = [1, 1]} : vector<8x4xf32> to vector<8x1xf32>
    %377 = vector.broadcast %376 : vector<8x1xf32> to vector<8x256xf32>
    %378 = arith.mulf %377, %275 : vector<8x256xf32>
    %379 = arith.addf %361, %378 : vector<8x256xf32>
    %380 = vector.extract_strided_slice %371 {offsets = [0, 2], sizes = [8, 1], strides = [1, 1]} : vector<8x4xf32> to vector<8x1xf32>
    %381 = vector.broadcast %380 : vector<8x1xf32> to vector<8x256xf32>
    %382 = arith.mulf %381, %275 : vector<8x256xf32>
    %383 = arith.addf %365, %382 : vector<8x256xf32>
    %384 = vector.extract_strided_slice %371 {offsets = [0, 3], sizes = [8, 1], strides = [1, 1]} : vector<8x4xf32> to vector<8x1xf32>
    %385 = vector.broadcast %384 : vector<8x1xf32> to vector<8x256xf32>
    %386 = arith.mulf %385, %275 : vector<8x256xf32>
    %387 = arith.addf %369, %386 : vector<8x256xf32>
    %c1_70 = arith.constant 1 : index
    %c6_71 = arith.constant 6 : index
    %c0_72 = arith.constant 0 : index
    %c0_73 = arith.constant 0 : index
    %388 = vector.load %arg2[%c1_70, %c6_71, %c0_72, %c0_73] : memref<2x9x8x4xf32, #tpu.memory_space<vmem>>, vector<1x1x8x4xf32>
    %389 = vector.shape_cast %388 : vector<1x1x8x4xf32> to vector<8x4xf32>
    %390 = vector.extract_strided_slice %389 {offsets = [0, 0], sizes = [8, 1], strides = [1, 1]} : vector<8x4xf32> to vector<8x1xf32>
    %391 = vector.broadcast %390 : vector<8x1xf32> to vector<8x256xf32>
    %392 = arith.mulf %391, %282 : vector<8x256xf32>
    %393 = arith.addf %375, %392 : vector<8x256xf32>
    %394 = vector.extract_strided_slice %389 {offsets = [0, 1], sizes = [8, 1], strides = [1, 1]} : vector<8x4xf32> to vector<8x1xf32>
    %395 = vector.broadcast %394 : vector<8x1xf32> to vector<8x256xf32>
    %396 = arith.mulf %395, %282 : vector<8x256xf32>
    %397 = arith.addf %379, %396 : vector<8x256xf32>
    %398 = vector.extract_strided_slice %389 {offsets = [0, 2], sizes = [8, 1], strides = [1, 1]} : vector<8x4xf32> to vector<8x1xf32>
    %399 = vector.broadcast %398 : vector<8x1xf32> to vector<8x256xf32>
    %400 = arith.mulf %399, %282 : vector<8x256xf32>
    %401 = arith.addf %383, %400 : vector<8x256xf32>
    %402 = vector.extract_strided_slice %389 {offsets = [0, 3], sizes = [8, 1], strides = [1, 1]} : vector<8x4xf32> to vector<8x1xf32>
    %403 = vector.broadcast %402 : vector<8x1xf32> to vector<8x256xf32>
    %404 = arith.mulf %403, %282 : vector<8x256xf32>
    %405 = arith.addf %387, %404 : vector<8x256xf32>
    %c1_74 = arith.constant 1 : index
    %c7_75 = arith.constant 7 : index
    %c0_76 = arith.constant 0 : index
    %c0_77 = arith.constant 0 : index
    %406 = vector.load %arg2[%c1_74, %c7_75, %c0_76, %c0_77] : memref<2x9x8x4xf32, #tpu.memory_space<vmem>>, vector<1x1x8x4xf32>
    %407 = vector.shape_cast %406 : vector<1x1x8x4xf32> to vector<8x4xf32>
    %408 = vector.extract_strided_slice %407 {offsets = [0, 0], sizes = [8, 1], strides = [1, 1]} : vector<8x4xf32> to vector<8x1xf32>
    %409 = vector.broadcast %408 : vector<8x1xf32> to vector<8x256xf32>
    %410 = arith.mulf %409, %259 : vector<8x256xf32>
    %411 = arith.addf %393, %410 : vector<8x256xf32>
    %412 = vector.extract_strided_slice %407 {offsets = [0, 1], sizes = [8, 1], strides = [1, 1]} : vector<8x4xf32> to vector<8x1xf32>
    %413 = vector.broadcast %412 : vector<8x1xf32> to vector<8x256xf32>
    %414 = arith.mulf %413, %259 : vector<8x256xf32>
    %415 = arith.addf %397, %414 : vector<8x256xf32>
    %416 = vector.extract_strided_slice %407 {offsets = [0, 2], sizes = [8, 1], strides = [1, 1]} : vector<8x4xf32> to vector<8x1xf32>
    %417 = vector.broadcast %416 : vector<8x1xf32> to vector<8x256xf32>
    %418 = arith.mulf %417, %259 : vector<8x256xf32>
    %419 = arith.addf %401, %418 : vector<8x256xf32>
    %420 = vector.extract_strided_slice %407 {offsets = [0, 3], sizes = [8, 1], strides = [1, 1]} : vector<8x4xf32> to vector<8x1xf32>
    %421 = vector.broadcast %420 : vector<8x1xf32> to vector<8x256xf32>
    %422 = arith.mulf %421, %259 : vector<8x256xf32>
    %423 = arith.addf %405, %422 : vector<8x256xf32>
    %c1_78 = arith.constant 1 : index
    %c8_79 = arith.constant 8 : index
    %c0_80 = arith.constant 0 : index
    %c0_81 = arith.constant 0 : index
    %424 = vector.load %arg2[%c1_78, %c8_79, %c0_80, %c0_81] : memref<2x9x8x4xf32, #tpu.memory_space<vmem>>, vector<1x1x8x4xf32>
    %425 = vector.shape_cast %424 : vector<1x1x8x4xf32> to vector<8x4xf32>
    %426 = vector.extract_strided_slice %425 {offsets = [0, 0], sizes = [8, 1], strides = [1, 1]} : vector<8x4xf32> to vector<8x1xf32>
    %427 = vector.broadcast %426 : vector<8x1xf32> to vector<8x256xf32>
    %428 = arith.mulf %427, %283 : vector<8x256xf32>
    %429 = arith.addf %411, %428 : vector<8x256xf32>
    %430 = vector.extract_strided_slice %425 {offsets = [0, 1], sizes = [8, 1], strides = [1, 1]} : vector<8x4xf32> to vector<8x1xf32>
    %431 = vector.broadcast %430 : vector<8x1xf32> to vector<8x256xf32>
    %432 = arith.mulf %431, %283 : vector<8x256xf32>
    %433 = arith.addf %415, %432 : vector<8x256xf32>
    %434 = vector.extract_strided_slice %425 {offsets = [0, 2], sizes = [8, 1], strides = [1, 1]} : vector<8x4xf32> to vector<8x1xf32>
    %435 = vector.broadcast %434 : vector<8x1xf32> to vector<8x256xf32>
    %436 = arith.mulf %435, %283 : vector<8x256xf32>
    %437 = arith.addf %419, %436 : vector<8x256xf32>
    %438 = vector.extract_strided_slice %425 {offsets = [0, 3], sizes = [8, 1], strides = [1, 1]} : vector<8x4xf32> to vector<8x1xf32>
    %439 = vector.broadcast %438 : vector<8x1xf32> to vector<8x256xf32>
    %440 = arith.mulf %439, %283 : vector<8x256xf32>
    %441 = arith.addf %423, %440 : vector<8x256xf32>
    %442 = vector.extract_strided_slice %429 {offsets = [0, 0], sizes = [4, 256], strides = [1, 1]} : vector<8x256xf32> to vector<4x256xf32>
    %cst_82 = arith.constant dense<0.000000e+00> : vector<256xf32>
    %443 = vector.multi_reduction <add>, %442, %cst_82 [0] : vector<4x256xf32> to vector<256xf32>
    %444 = vector.shape_cast %443 : vector<256xf32> to vector<1x256xf32>
    %445 = vector.extract_strided_slice %433 {offsets = [0, 0], sizes = [4, 256], strides = [1, 1]} : vector<8x256xf32> to vector<4x256xf32>
    %cst_83 = arith.constant dense<0.000000e+00> : vector<256xf32>
    %446 = vector.multi_reduction <add>, %445, %cst_83 [0] : vector<4x256xf32> to vector<256xf32>
    %447 = vector.shape_cast %446 : vector<256xf32> to vector<1x256xf32>
    %448 = vector.extract_strided_slice %437 {offsets = [0, 0], sizes = [4, 256], strides = [1, 1]} : vector<8x256xf32> to vector<4x256xf32>
    %cst_84 = arith.constant dense<0.000000e+00> : vector<256xf32>
    %449 = vector.multi_reduction <add>, %448, %cst_84 [0] : vector<4x256xf32> to vector<256xf32>
    %450 = vector.shape_cast %449 : vector<256xf32> to vector<1x256xf32>
    %451 = vector.extract_strided_slice %441 {offsets = [0, 0], sizes = [4, 256], strides = [1, 1]} : vector<8x256xf32> to vector<4x256xf32>
    %cst_85 = arith.constant dense<0.000000e+00> : vector<256xf32>
    %452 = vector.multi_reduction <add>, %451, %cst_85 [0] : vector<4x256xf32> to vector<256xf32>
    %453 = vector.shape_cast %452 : vector<256xf32> to vector<1x256xf32>
    %454 = vector.extract_strided_slice %429 {offsets = [4, 0], sizes = [4, 256], strides = [1, 1]} : vector<8x256xf32> to vector<4x256xf32>
    %cst_86 = arith.constant dense<0.000000e+00> : vector<256xf32>
    %455 = vector.multi_reduction <add>, %454, %cst_86 [0] : vector<4x256xf32> to vector<256xf32>
    %456 = vector.shape_cast %455 : vector<256xf32> to vector<1x256xf32>
    %457 = vector.extract_strided_slice %433 {offsets = [4, 0], sizes = [4, 256], strides = [1, 1]} : vector<8x256xf32> to vector<4x256xf32>
    %cst_87 = arith.constant dense<0.000000e+00> : vector<256xf32>
    %458 = vector.multi_reduction <add>, %457, %cst_87 [0] : vector<4x256xf32> to vector<256xf32>
    %459 = vector.shape_cast %458 : vector<256xf32> to vector<1x256xf32>
    %460 = vector.extract_strided_slice %437 {offsets = [4, 0], sizes = [4, 256], strides = [1, 1]} : vector<8x256xf32> to vector<4x256xf32>
    %cst_88 = arith.constant dense<0.000000e+00> : vector<256xf32>
    %461 = vector.multi_reduction <add>, %460, %cst_88 [0] : vector<4x256xf32> to vector<256xf32>
    %462 = vector.shape_cast %461 : vector<256xf32> to vector<1x256xf32>
    %463 = vector.extract_strided_slice %441 {offsets = [4, 0], sizes = [4, 256], strides = [1, 1]} : vector<8x256xf32> to vector<4x256xf32>
    %cst_89 = arith.constant dense<0.000000e+00> : vector<256xf32>
    %464 = vector.multi_reduction <add>, %463, %cst_89 [0] : vector<4x256xf32> to vector<256xf32>
    %465 = vector.shape_cast %464 : vector<256xf32> to vector<1x256xf32>
    %466 = tpu.concatenate %444, %447, %450, %453, %456, %459, %462, %465 in 0 : vector<1x256xf32>, vector<1x256xf32>, vector<1x256xf32>, vector<1x256xf32>, vector<1x256xf32>, vector<1x256xf32>, vector<1x256xf32>, vector<1x256xf32> -> vector<8x256xf32>
    %cst_90 = arith.constant dense<0.000000e+00> : vector<8xf32>
    %467 = vector.multi_reduction <add>, %466, %cst_90 [1] : vector<8x256xf32> to vector<8xf32>
    %468 = vector.shape_cast %467 : vector<8xf32> to vector<8x1xf32>
    %cst_91 = arith.constant 2.560000e+02 : f32
    %469 = vector.broadcast %cst_91 : f32 to vector<8x1xf32>
    %470 = arith.divf %468, %469 : vector<8x1xf32>
    %471 = vector.broadcast %470 : vector<8x1xf32> to vector<8x256xf32>
    %472 = arith.subf %466, %471 : vector<8x256xf32>
    %473 = arith.mulf %472, %472 : vector<8x256xf32>
    %cst_92 = arith.constant dense<0.000000e+00> : vector<8xf32>
    %474 = vector.multi_reduction <add>, %473, %cst_92 [1] : vector<8x256xf32> to vector<8xf32>
    %475 = vector.shape_cast %474 : vector<8xf32> to vector<8x1xf32>
    %cst_93 = arith.constant 2.560000e+02 : f32
    %476 = vector.broadcast %cst_93 : f32 to vector<8x1xf32>
    %477 = arith.divf %475, %476 : vector<8x1xf32>
    %c1_94 = arith.constant 1 : index
    %c0_95 = arith.constant 0 : index
    %c0_96 = arith.constant 0 : index
    %478 = vector.load %arg3[%c1_94, %c0_95, %c0_96] : memref<2x8x2xf32, #tpu.memory_space<vmem>>, vector<1x8x2xf32>
    %479 = vector.shape_cast %478 : vector<1x8x2xf32> to vector<8x2xf32>
    %cst_97 = arith.constant 9.99999974E-6 : f32
    %480 = vector.broadcast %cst_97 : f32 to vector<8x1xf32>
    %481 = arith.addf %477, %480 : vector<8x1xf32>
    %482 = math.rsqrt %481 : vector<8x1xf32>
    %483 = vector.extract_strided_slice %479 {offsets = [0, 0], sizes = [8, 1], strides = [1, 1]} : vector<8x2xf32> to vector<8x1xf32>
    %484 = arith.mulf %482, %483 : vector<8x1xf32>
    %485 = vector.broadcast %484 : vector<8x1xf32> to vector<8x256xf32>
    %486 = arith.mulf %472, %485 : vector<8x256xf32>
    %487 = vector.extract_strided_slice %479 {offsets = [0, 1], sizes = [8, 1], strides = [1, 1]} : vector<8x2xf32> to vector<8x1xf32>
    %488 = vector.broadcast %487 : vector<8x1xf32> to vector<8x256xf32>
    %489 = arith.addf %486, %488 : vector<8x256xf32>
    %cst_98 = arith.constant 2.000000e-01 : f32
    %490 = vector.broadcast %cst_98 : f32 to vector<8x256xf32>
    %491 = arith.mulf %0, %490 : vector<8x256xf32>
    %492 = arith.addf %491, %489 : vector<8x256xf32>
    %c0_99 = arith.constant 0 : index
    %c0_100 = arith.constant 0 : index
    %493 = vector.load %arg4[%c0_99, %c0_100] : memref<8x256xf32, #tpu.memory_space<vmem>>, vector<8x256xf32>
    tpu.vector_store %arg4[%c0_99, %c0_100], %492 {strides = array<i32>} : memref<8x256xf32, #tpu.memory_space<vmem>>, vector<8x256xf32>,
    return
  }
  func.func @transform_0(%arg0: i32) -> (i32, i32) {
    %c0_i32 = arith.constant 0 : i32
    %c0_i32_0 = arith.constant 0 : i32
    %c0_i32_1 = arith.constant 0 : i32
    return %c0_i32, %c0_i32_0 : i32, i32
  }
  func.func @transform_1(%arg0: i32) -> (i32, i32, i32, i32) {
    %c0_i32 = arith.constant 0 : i32
    %c0_i32_0 = arith.constant 0 : i32
    %c0_i32_1 = arith.constant 0 : i32
    %c0_i32_2 = arith.constant 0 : i32
    %c0_i32_3 = arith.constant 0 : i32
    return %c0_i32, %c0_i32_0, %c0_i32_1, %c0_i32_2 : i32, i32, i32, i32
  }
  func.func @transform_2(%arg0: i32) -> (i32, i32, i32) {
    %c0_i32 = arith.constant 0 : i32
    %c0_i32_0 = arith.constant 0 : i32
    %c0_i32_1 = arith.constant 0 : i32
    %c0_i32_2 = arith.constant 0 : i32
    return %c0_i32, %c0_i32_0, %c0_i32_1 : i32, i32, i32
  }
  func.func @transform_3(%arg0: i32) -> (i32, i32) {
    %c0_i32 = arith.constant 0 : i32
    %c0_i32_0 = arith.constant 0 : i32
    %c0_i32_1 = arith.constant 0 : i32
    return %c0_i32, %c0_i32_0 : i32, i32
  }
}

</mosaic_0001>

<bundles_post_ra>
// kernel: tpu_custom_call.1
= control target key start
LH: loop header
LB: loop body
LE: loop exit
PB: predicated region body
PF: predicated region fallthrough
CT: control target
= control target key end

     0   :  { %s1384_s16 = smov 1   ;;  %s1385_s17 = smov 16   ;;  %v2274_v2 = vmov 1   ;;  %s2270_s0 = inlined_call_operand.vmem [shape: f32[8,256], index: 0, kind: input, shape index: {}]   ;;  %s2271_s1 = inlined_call_operand.vmem [shape: f32[2,9,8,4], index: 1, kind: input, shape index: {}]   ;;  %s2272_s2 = inlined_call_operand.vmem [shape: f32[2,8,2], index: 2, kind: input, shape index: {}]   ;;  %s2273_s3 = inlined_call_operand.hbm [shape: f32[8,256], index: 3, kind: output, shape index: {}]  }
   0x1   :  { %v1417_v0 = vld [vmem:[%s2270_s0 + $0x8] sm:$0xff]  ;;  %v1422_v1 = vld [vmem:[%s2270_s0] sm:$0xff]  ;;  %s1386_s18 = smov 112   ;;  %1281 = vset.pattern.permute.xlu2 %v2274_v2 }
   0x2   :  { %82 = vrot.lane.b32.xlu2 %v1417_v0, %s1384_s16  ;;  %42 = vrot.lane.b32.xlu1 %v1417_v0, %s1385_s17 }
   0x3   :  { %32 = vrot.lane.b32.xlu0 %v1422_v1, %s1386_s18 }
   0x4   :  { %8 = vsyncpa [#allocation3], 0  ;;  %v2280_v3 = vmov 0   ;;  %s1389_s19 = smov 127   ;;  %v128_v4 = vld [vmem:[%s2271_s1] sm:$0xff]  ;;  %v1254_v5 = vld [vmem:[%s2271_s1 + $0x18] sm:$0xff]  ;;  %v17_v18 = vlaneseq }
   0x5   :  { %1290 = vset.pattern.permute.xlu0 %v2280_v3  ;;  %1280 = vset.pattern.permute.xlu1 %v2280_v3  ;;  %v1452_v6 = vld [vmem:[%s2271_s1 + $0x8] sm:$0xff]  ;;  %v1255_v7 = vld [vmem:[%s2271_s1 + $0x20] sm:$0xff]  ;;  %v2278_v8 = vmov 3   ;;  %v2276_v9 = vmov 2   ;;  %v1253_v10 = vld [vmem:[%s2271_s1 + $0x10] sm:$0xff]  ;;  %vm47_vm0 = vcmask 130048  }
   0x6   :  { %v1473_v11 = vld [vmem:[%s2271_s1 + $0x28] sm:$0xff]  ;;  %v1496_v19 = vand.u32 127, %v17_v18  ;;  %vm36_vm1 = vcmask 916480   ;;  %vm72_vm3 = vcmask 1039360   ;;  %vm63_vm5 = vcmask 7168   ;;  %v1257_v49 = vld [vmem:[%s2271_s1 + $0x30] sm:$0xff] }
   0x7   :  { %v2306_v32 = vmov 0  ;;  %v1258_v54 = vld [vmem:[%s2271_s1 + $0x38] sm:$0xff]  ;;  %v1259_v56 = vld [vmem:[%s2271_s1 + $0x40] sm:$0xff]  ;;  %vm434_vm10 = vcmask 1043456   ;;  %vm571_vm11 = vcmask 1040384   ;;  %vm2286_vm12 = vcmask 1041408  }
   0x8   :  { %2302 = vst [vmem:[#allocation5_spill] sm:$0xff] %v1496_v19  ;;  %vm26_vm2 = vcmp.lt.s32.totalorder %v1496_v19, 16  ;;  %v1504_v24 = vadd.s32 128, %v1496_v19  ;;  %v20_v29 = vand.u32 15, %v1496_v19  ;;  %vm577_vm13 = vcmask 1042432   ;;  %s1243_s12 = sshll.u32 %s2273_s3, 4  ;;  %s1244_s12 = int_to_ptr.hbm [resolvable:$true] %s1243_s12 }
   0x9   :  { %vm2289_vm14 = vcmask 1044480   ;;  %vm2288_vm15 = vcmask 1045504  }
   0xa   :  { %93 = vrot.lane.b32.xlu2 %v1417_v0, %s1389_s19  ;;  %45 = vrot.lane.b32.xlu1 %v1422_v1, %s1385_s17  ;;  %2303 = vst [vmem:[#allocation6_spill] sm:$0xff] %v1504_v24  ;;  %v21_v27 = vand.u32 15, %v1504_v24  ;;  %vm29_vm4 = vcmp.ge.s32.totalorder %v1504_v24, 240  ;;  %vm1534_vm8 = vcmp.eq.s32.totalorder %v20_v29, 0  ;;  %vm1538_vm9 = vcmp.eq.s32.totalorder %v20_v29, 15 }
   0xb   :  { %34 = vrot.lane.b32.xlu0 %v1417_v0, %s1386_s18 }
   0xc   :  { %vm1526_vm6 = vcmp.eq.s32.totalorder %v21_v27, 0  ;;  %vm1530_vm7 = vcmp.eq.s32.totalorder %v21_v27, 15 }
   0xd   :  { %v2307_v32 = vsel %vm1530_vm7, 4294967295, %v2306_v32 }
   0xe   :  { %2308 = vst [vmem:[#allocation7_spill] sm:$0xff] %v2307_v32 }
  0x12   :  { %137 = vperm.xlu2 %1281, %v128_v4   ;;  %91 = vrot.lane.b32.xlu1 %v1422_v1, %s1389_s19 }
  0x13   :  { %85 = vrot.lane.b32.xlu0 %v1422_v1, %s1384_s16 }
  0x1a   :  { %1283 = vset.pattern.permute.xlu2 %v2280_v3  ;;  %131 = vperm.xlu1 %1280, %v128_v4  }
  0x1b   :  { %228 = vperm.xlu0 %1290, %v1254_v5   ;;  %158 = vperm.xlu2 %1283, %v1452_v6  }
  0x22   :  { %1282 = vset.pattern.permute.xlu1 %v2278_v8 }
  0x23   :  { %1295 = vset.pattern.permute.xlu0 %v2274_v2  ;;  %1285 = vset.pattern.permute.xlu2 %v2276_v9 }
  0x24   :  { %149 = vperm.xlu1 %1282, %v128_v4   ;;  %271 = vperm.xlu0 %1295, %v1255_v7  }
  0x25   :  { %174 = vperm.xlu2 %1285, %v1452_v6  }
  0x2c   :  { %1284 = vset.pattern.permute.xlu1 %v2274_v2  ;;  %1296 = vset.pattern.permute.xlu0 %v2276_v9 }
  0x2d   :  { %1287 = vset.pattern.permute.xlu2 %v2274_v2  ;;  %166 = vperm.xlu1 %1284, %v1452_v6  }
  0x2e   :  { %143 = vperm.xlu0 %1296, %v128_v4   ;;  %201 = vperm.xlu2 %1287, %v1253_v10  }
  0x35   :  { %1286 = vset.pattern.permute.xlu1 %v2280_v3 }
  0x36   :  { %314 = vperm.xlu0 %1296, %v1473_v11   ;;  %1289 = vset.pattern.permute.xlu2 %v2278_v8 }
  0x37   :  { %193 = vperm.xlu1 %1286, %v1253_v10   ;;  %217 = vperm.xlu2 %1289, %v1253_v10  }
  0x3e   :  { %1301 = vset.pattern.permute.xlu0 %v2278_v8 }
  0x3f   :  { %1288 = vset.pattern.permute.xlu1 %v2276_v9  ;;  %1292 = vset.pattern.permute.xlu2 %v2276_v9 }
  0x40   :  { %209 = vperm.xlu1 %1288, %v1253_v10   ;;  %244 = vperm.xlu2 %1292, %v1254_v5  }
  0x48   :  { %1291 = vset.pattern.permute.xlu1 %v2274_v2  ;;  %1294 = vset.pattern.permute.xlu2 %v2280_v3 }
  0x49   :  { %236 = vperm.xlu1 %1291, %v1254_v5   ;;  %263 = vperm.xlu2 %1294, %v1255_v7  }
  0x51   :  { %1293 = vset.pattern.permute.xlu1 %v2278_v8  ;;  %1298 = vset.pattern.permute.xlu2 %v2278_v8 }
  0x52   :  { %252 = vperm.xlu1 %1293, %v1254_v5   ;;  %287 = vperm.xlu2 %1298, %v1255_v7  }
  0x5a   :  { %1297 = vset.pattern.permute.xlu1 %v2276_v9  ;;  %1300 = vset.pattern.permute.xlu2 %v2274_v2 }
  0x5b   :  { %279 = vperm.xlu1 %1297, %v1255_v7   ;;  %306 = vperm.xlu2 %1300, %v1473_v11  }
  0x5c   :  { %v83_v12 = vpop.permute.xlu2 %82 }
  0x63   :  { %1299 = vset.pattern.permute.xlu1 %v2280_v3  ;;  %1303 = vset.pattern.permute.xlu2 %v2280_v3 }
  0x64   :  { %298 = vperm.xlu1 %1299, %v1473_v11   ;;  %v94_v13 = vpop.permute.xlu2 %93 }
  0x6c   :  { %v1491_v14 = vpop.permute.xlu2 %137  ;;  %1302 = vset.pattern.permute.xlu1 %v2278_v8 }
  0x74   :  { %v43_v15 = vpop.permute.xlu1 %42 }
  0x75   :  { %v33_v16 = vpop.permute.xlu0 %32  ;;  %v1494_v17 = vpop.permute.xlu2 %158 }
  0x7c   :  { %v46_v20 = vpop.permute.xlu1 %45 }
  0x7d   :  { %v1500_v21 = vsel %vm47_vm0, %v46_v20, %v43_v15  ;;  %v51_v22 = vsel %vm47_vm0, %v43_v15, %v46_v20  ;;  %v35_v23 = vpop.permute.xlu0 %34 }
  0x7e   :  { %v1507_v25 = vsel %vm36_vm1, %v33_v16, %v35_v23  ;;  %70 = vrot.lane.b32.xlu1 %v1500_v21, %s1389_s19  ;;  %57 = vrot.lane.b32.xlu2 %v1500_v21, %s1384_s16  ;;  %v41_v30 = vsel %vm36_vm1, %v35_v23, %v33_v16  ;;  %v162_v29 = vmul.f32 %v1494_v17, %v1500_v21 }
  0x7f   :  { %v1516_v26 = vsel %vm26_vm2, %v1507_v25, %v51_v22  ;;  %v1519_v28 = vpop.permute.xlu2 %174  ;;  %v1547_v39 = vsel %vm29_vm4, %v1500_v21, %v41_v30 }
  0x80   :  { %68 = vrot.lane.b32.xlu0 %v1516_v26, %s1389_s19  ;;  %v177_v23 = vmul.f32 %v1519_v28, %v1516_v26  ;;  %v178_v30 = vmul.f32 %v1519_v28, %v1500_v21 }
  0x84   :  { %v92_v33 = vpop.permute.xlu1 %91 }
  0x85   :  { %v95_v36 = vsel %vm72_vm3, %v92_v33, %v94_v13  ;;  %v99_v37 = vsel %vm72_vm3, %v94_v13, %v92_v33  ;;  %v86_v38 = vpop.permute.xlu0 %85 }
  0x86   :  { %115 = vrot.lane.b32.xlu2 %v1507_v25, %s1389_s19  ;;  %109 = vrot.lane.b32.xlu1 %v1507_v25, %s1384_s16  ;;  %v87_v40 = vsel %vm63_vm5, %v86_v38, %v83_v12  ;;  %v90_v41 = vsel %vm63_vm5, %v83_v12, %v86_v38 }
  0x87   :  { %v1557_v42 = vsel %vm1534_vm8, %v95_v36, %v90_v41  ;;  %v1561_v43 = vsel %vm1526_vm6, %v99_v37, %v87_v40  ;;  %v1565_v44 = vsel %vm1538_vm9, %v90_v41, %v95_v36  ;;  %v1569_v45 = vsel %vm1530_vm7, %v87_v40, %v99_v37 }
  0x88   :  { %105 = vrot.lane.b32.xlu0 %v1547_v39, %s1384_s16  ;;  %v1573_v46 = vpop.permute.xlu2 %201  ;;  %v161_v37 = vmul.f32 %v1494_v17, %v1516_v26 }
  0x8c   :  { %v1575_v47 = vpop.permute.xlu1 %131 }
  0x8d   :  { %v229_v7 = vpop.permute.xlu0 %228 }
  0x8e   :  { %322 = vperm.xlu1 %1302, %v1473_v11   ;;  %61 = vrot.lane.b32.xlu2 %v1516_v26, %s1384_s16  ;;  %v231_v33 = vmul.f32 %v229_v7, %v1557_v42  ;;  %v232_v36 = vmul.f32 %v229_v7, %v1561_v43 }
  0x90   :  { %117 = vrot.lane.b32.xlu0 %v1547_v39, %s1389_s19 }
  0x91   :  { %v1582_v48 = vpop.permute.xlu2 %217 }
  0x96   :  { %1304 = vset.pattern.permute.xlu1 %v2274_v2  ;;  %333 = vperm.xlu2 %1303, %v1257_v49   ;;  %v1588_v50 = vpop.permute.xlu1 %149  ;;  %v272_v11 = vpop.permute.xlu0 %271 }
  0x97   :  { %341 = vperm.xlu1 %1304, %v1257_v49   ;;  %v274_v38 = vmul.f32 %v272_v11, %v1422_v1  ;;  %v275_v40 = vmul.f32 %v272_v11, %v1417_v0 }
  0x98   :  { %182 = vperm.xlu0 %1301, %v1452_v6  }
  0x9a   :  { %v245_v51 = vpop.permute.xlu2 %244 }
  0x9b   :  { %v1592_v52 = vmul.f32 %v245_v51, %v1557_v42  ;;  %v1595_v53 = vmul.f32 %v245_v51, %v1561_v43 }
  0x9e   :  { %1305 = vset.pattern.permute.xlu2 %v2276_v9 }
  0x9f   :  { %1306 = vset.pattern.permute.xlu1 %v2280_v3  ;;  %349 = vperm.xlu2 %1305, %v1257_v49   ;;  %v167_v55 = vpop.permute.xlu1 %166 }
  0xa0   :  { %357 = vperm.xlu0 %1301, %v1257_v49   ;;  %368 = vperm.xlu1 %1306, %v1258_v54   ;;  %v144_v15 = vpop.permute.xlu0 %143  ;;  %v169_v41 = vmul.f32 %v167_v55, %v1516_v26  ;;  %v170_v49 = vmul.f32 %v167_v55, %v1500_v21 }
  0xa3   :  { %v1615_v60 = vpop.permute.xlu2 %263 }
  0xa7   :  { %1307 = vset.pattern.permute.xlu2 %v2274_v2 }
  0xa8   :  { %1310 = vset.pattern.permute.xlu0 %v2280_v3  ;;  %1308 = vset.pattern.permute.xlu1 %v2276_v9  ;;  %v1637_v20 = vpop.permute.xlu0 %314 }
  0xa9   :  { %403 = vperm.xlu0 %1310, %v1259_v56   ;;  %376 = vperm.xlu2 %1307, %v1258_v54   ;;  %v194_v57 = vpop.permute.xlu1 %193 }
  0xaa   :  { %384 = vperm.xlu1 %1308, %v1258_v54  }
  0xac   :  { %v1631_v6 = vpop.permute.xlu2 %287 }
  0xb1   :  { %1309 = vset.pattern.permute.xlu2 %v2278_v8  ;;  %1327 = vset.pattern.permute.xlu0 %v2274_v2 }
  0xb2   :  { %v1610_v58 = vpop.permute.xlu1 %209  ;;  %1311 = vset.pattern.permute.xlu1 %v2274_v2  ;;  %392 = vperm.xlu2 %1309, %v1258_v54  }
  0xb3   :  { %411 = vperm.xlu1 %1311, %v1259_v56  }
  0xb5   :  { %v307_v10 = vpop.permute.xlu2 %306 }
  0xba   :  { %1312 = vset.pattern.permute.xlu2 %v2276_v9 }
  0xbb   :  { %v237_v59 = vpop.permute.xlu1 %236  ;;  %1313 = vset.pattern.permute.xlu1 %v2278_v8  ;;  %419 = vperm.xlu2 %1312, %v1259_v56  }
  0xbc   :  { %v1618_v61 = vmul.f32 %v237_v59, %v1557_v42  ;;  %v1621_v62 = vmul.f32 %v237_v59, %v1561_v43  ;;  %427 = vperm.xlu1 %1313, %v1259_v56  }
  0xc3   :  { %1316 = vset.pattern.permute.xlu2 %v2274_v2 }
  0xc4   :  { %v253_v63 = vpop.permute.xlu1 %252  ;;  %1314 = vset.pattern.permute.xlu1 %v2274_v2 }
  0xc5   :  { %v1626_v4 = vmul.f32 %v253_v63, %v1557_v42  ;;  %v1629_v5 = vmul.f32 %v253_v63, %v1561_v43 }
  0xcd   :  { %v280_v13 = vpop.permute.xlu1 %279 }
  0xd6   :  { %v1635_v18 = vpop.permute.xlu1 %298 }
  0xd8   :  { %v58_v12 = vpop.permute.xlu2 %57 }
  0xe0   :  { %v1633_v16 = vpop.permute.xlu2 %115 }
  0xe8   :  { %v62_v22 = vpop.permute.xlu2 %61 }
  0xe9   :  { %v64_v54 = vsel %vm63_vm5, %v62_v22, %v58_v12  ;;  %v67_v28 = vsel %vm63_vm5, %v58_v12, %v62_v22 }
  0xf0   :  { %v71_v27 = vpop.permute.xlu1 %70  ;;  %v1657_v56 = vpop.permute.xlu2 %333 }
  0xf2   :  { %v69_v51 = vpop.permute.xlu0 %68 }
  0xf3   :  { %v73_v42 = vsel %vm72_vm3, %v69_v51, %v71_v27  ;;  %v77_v43 = vsel %vm72_vm3, %v71_v27, %v69_v51 }
  0xf4   :  { %v1661_v17 = vsel %vm1534_vm8, %v73_v42, %v67_v28  ;;  %v1665_v59 = vsel %vm1526_vm6, %v77_v43, %v64_v54  ;;  %v1669_v55 = vsel %vm1538_vm9, %v67_v28, %v73_v42  ;;  %v1673_v63 = vsel %vm1530_vm7, %v64_v54, %v77_v43 }
  0xf5   :  { %v134_v7 = vmul.f32 %v1575_v47, %v1661_v17  ;;  %v135_v11 = vmul.f32 %v1575_v47, %v1665_v59  ;;  %v140_v12 = vmul.f32 %v1491_v14, %v1661_v17  ;;  %v141_v22 = vmul.f32 %v1491_v14, %v1665_v59 }
  0xf6   :  { %v146_v27 = vmul.f32 %v144_v15, %v1661_v17  ;;  %v147_v51 = vmul.f32 %v144_v15, %v1665_v59  ;;  %v196_v28 = vmul.f32 %v194_v57, %v1669_v55  ;;  %v197_v54 = vmul.f32 %v194_v57, %v1673_v63 }
  0xf7   :  { %v163_v42 = vadd.f32 %v161_v37, %v134_v7  ;;  %v164_v43 = vadd.f32 %v162_v29, %v135_v11  ;;  %v171_v2 = vadd.f32 %v169_v41, %v140_v12  ;;  %v172_v9 = vadd.f32 %v170_v49, %v141_v22 }
  0xf8   :  { %v179_v8 = vadd.f32 %v177_v23, %v146_v27  ;;  %v180_v47 = vadd.f32 %v178_v30, %v147_v51  ;;  %v204_v3 = vmul.f32 %v1573_v46, %v1669_v55  ;;  %v205_v14 = vmul.f32 %v1573_v46, %v1673_v63  ;;  %v1691_v24 = vpop.permute.xlu1 %109 }
  0xf9   :  { %v198_v19 = vadd.f32 %v196_v28, %v163_v42  ;;  %v199_v15 = vadd.f32 %v197_v54, %v164_v43  ;;  %v212_v32 = vmul.f32 %v1610_v58, %v1669_v55  ;;  %v213_v57 = vmul.f32 %v1610_v58, %v1673_v63 }
  0xfa   :  { %v266_v23 = vmul.f32 %v1615_v60, %v1422_v1  ;;  %v267_v29 = vmul.f32 %v1615_v60, %v1417_v0  ;;  %v206_v30 = vadd.f32 %v204_v3, %v171_v2  ;;  %v207_v37 = vadd.f32 %v205_v14, %v172_v9  ;;  %v106_v41 = vpop.permute.xlu0 %105  ;;  %v350_v2 = vpop.permute.xlu2 %349 }
  0xfb   :  { %v317_v46 = vmul.f32 %v1637_v20, %v1565_v44  ;;  %v309_v49 = vmul.f32 %v307_v10, %v1565_v44  ;;  %v214_v7 = vadd.f32 %v212_v32, %v179_v8  ;;  %v215_v11 = vadd.f32 %v213_v57, %v180_v47 }
  0xfc   :  { %v310_v12 = vmul.f32 %v307_v10, %v1569_v45  ;;  %v282_v58 = vmul.f32 %v280_v13, %v1422_v1  ;;  %v241_v22 = vadd.f32 %v1618_v61, %v206_v30  ;;  %v242_v27 = vadd.f32 %v1621_v62, %v207_v37 }
  0xfd   :  { %v283_v60 = vmul.f32 %v280_v13, %v1417_v0  ;;  %v233_v3 = vadd.f32 %v231_v33, %v198_v19  ;;  %v234_v9 = vadd.f32 %v232_v36, %v199_v15  ;;  %v249_v51 = vadd.f32 %v1592_v52, %v214_v7 }
  0xfe   :  { %v301_v28 = vmul.f32 %v1635_v18, %v1565_v44  ;;  %v276_v8 = vadd.f32 %v274_v38, %v241_v22  ;;  %v277_v32 = vadd.f32 %v275_v40, %v242_v27  ;;  %v250_v10 = vadd.f32 %v1595_v53, %v215_v11 }
  0xff   :  { %v302_v54 = vmul.f32 %v1635_v18, %v1569_v45  ;;  %v268_v61 = vadd.f32 %v266_v23, %v233_v3  ;;  %v269_v42 = vadd.f32 %v267_v29, %v234_v9  ;;  %v284_v62 = vadd.f32 %v282_v58, %v249_v51 }
 0x100   :  { %v318_v13 = vmul.f32 %v1637_v20, %v1569_v45  ;;  %v323_v19 = vpop.permute.xlu1 %322  ;;  %v1717_v33 = vadd.f32 %v309_v49, %v276_v8  ;;  %v1719_v52 = vadd.f32 %v310_v12, %v277_v32  ;;  %v285_v36 = vadd.f32 %v283_v60, %v250_v10 }
 0x101   :  { %v303_v43 = vadd.f32 %v301_v28, %v268_v61  ;;  %v304_v38 = vadd.f32 %v302_v54, %v269_v42  ;;  %v319_v47 = vadd.f32 %v317_v46, %v284_v62  ;;  %v152_v57 = vmul.f32 %v1588_v50, %v1661_v17 }
 0x102   :  { %v118_v40 = vpop.permute.xlu0 %117  ;;  %v320_v53 = vadd.f32 %v318_v13, %v285_v36  ;;  %v153_v20 = vmul.f32 %v1588_v50, %v1665_v59  ;;  %v220_v30 = vmul.f32 %v1582_v48, %v1669_v55  ;;  %v221_v37 = vmul.f32 %v1582_v48, %v1673_v63 }
 0x103   :  { %v377_v14 = vpop.permute.xlu2 %376  ;;  %v119_v17 = vsel %vm72_vm3, %v1633_v16, %v118_v40  ;;  %v123_v50 = vsel %vm72_vm3, %v118_v40, %v1633_v16  ;;  %v111_v63 = vsel %vm63_vm5, %v1691_v24, %v106_v41  ;;  %v114_v12 = vsel %vm63_vm5, %v106_v41, %v1691_v24 }
 0x104   :  { %v325_v16 = vmul.f32 %v323_v19, %v1565_v44  ;;  %v326_v58 = vmul.f32 %v323_v19, %v1569_v45  ;;  %v1761_v8 = vsel %vm1538_vm9, %v114_v12, %v119_v17  ;;  %v1765_v10 = vsel %vm1530_vm7, %v111_v63, %v123_v50 }
 0x109   :  { %v342_v15 = vpop.permute.xlu1 %341 }
 0x10a   :  { %v183_v18 = vpop.permute.xlu0 %182 }
 0x10b   :  { %v185_v23 = vmul.f32 %v183_v18, %v1516_v26  ;;  %v186_v29 = vmul.f32 %v183_v18, %v1500_v21  ;;  %v290_v26 = vmul.f32 %v1631_v6, %v1422_v1  ;;  %v291_v21 = vmul.f32 %v1631_v6, %v1417_v0 }
 0x10c   :  { %v1741_v55 = vpop.permute.xlu2 %392  ;;  %v124_v0 = vsel %vm1534_vm8, %v119_v17, %v114_v12 }
 0x10d   :  { %v187_v46 = vadd.f32 %v185_v23, %v152_v57  ;;  %v188_v49 = vadd.f32 %v186_v29, %v153_v20  ;;  %v336_v3 = vmul.f32 %v1657_v56, %v124_v0  ;;  %v352_v44 = vmul.f32 %v350_v2, %v124_v0 }
 0x10e   :  { %v344_v51 = vmul.f32 %v342_v15, %v124_v0 }
 0x10f   :  { %v222_v7 = vadd.f32 %v220_v30, %v187_v46  ;;  %v223_v11 = vadd.f32 %v221_v37, %v188_v49  ;;  %v338_v54 = vadd.f32 %v336_v3, %v303_v43  ;;  %v354_v62 = vadd.f32 %v352_v44, %v319_v47 }
 0x110   :  { %v346_v43 = vadd.f32 %v344_v51, %v1717_v33  ;;  %v1781_v47 = vmul.f32 %v1741_v55, %v1507_v25 }
 0x111   :  { %v257_v59 = vadd.f32 %v1626_v4, %v222_v7  ;;  %v258_v48 = vadd.f32 %v1629_v5, %v223_v11  ;;  %v125_v4 = vsel %vm1526_vm6, %v123_v50, %v111_v63 }
 0x112   :  { %v358_v1 = vpop.permute.xlu0 %357  ;;  %v369_v22 = vpop.permute.xlu1 %368  ;;  %v337_v24 = vmul.f32 %v1657_v56, %v125_v4  ;;  %v353_v41 = vmul.f32 %v350_v2, %v125_v4  ;;  %v345_v28 = vmul.f32 %v342_v15, %v125_v4  ;;  %v1768_v56 = vmul.f32 %v377_v14, %v1507_v25 }
 0x113   :  { %v293_v5 = vadd.f32 %v291_v21, %v258_v48  ;;  %v292_v6 = vadd.f32 %v290_v26, %v257_v59  ;;  %v371_v45 = vmul.f32 %v369_v22, %v1507_v25  ;;  %v372_v9 = vmul.f32 %v369_v22, %v1547_v39 }
 0x114   :  { %v339_v61 = vadd.f32 %v337_v24, %v304_v38  ;;  %v1771_v2 = vmul.f32 %v377_v14, %v1547_v39  ;;  %v355_v13 = vadd.f32 %v353_v41, %v320_v53  ;;  %v347_v38 = vadd.f32 %v345_v28, %v1719_v52 }
 0x115   :  { %v1753_v27 = vadd.f32 %v326_v58, %v293_v5  ;;  %v327_v60 = vadd.f32 %v325_v16, %v292_v6  ;;  %v373_v19 = vadd.f32 %v371_v45, %v338_v54  ;;  %v420_v40 = vpop.permute.xlu2 %419  ;;  %v360_v53 = vmul.f32 %v358_v1, %v124_v0 }
 0x116   :  { %v374_v36 = vadd.f32 %v372_v9, %v339_v61  ;;  %v422_v30 = vmul.f32 %v420_v40, %v1761_v8  ;;  %v423_v37 = vmul.f32 %v420_v40, %v1765_v10  ;;  %v361_v21 = vmul.f32 %v358_v1, %v125_v4 }
 0x117   :  { %v362_v59 = vadd.f32 %v360_v53, %v327_v60 }
 0x118   :  { %v363_v40 = vadd.f32 %v361_v21, %v1753_v27 }
 0x11b   :  { %v404_v42 = vpop.permute.xlu0 %403 }
 0x11c   :  { %v406_v15 = vmul.f32 %v404_v42, %v1761_v8  ;;  %v407_v18 = vmul.f32 %v404_v42, %v1765_v10  ;;  %v385_v57 = vpop.permute.xlu1 %384 }
 0x11d   :  { %v387_v20 = vmul.f32 %v385_v57, %v1507_v25  ;;  %v388_v14 = vmul.f32 %v385_v57, %v1547_v39 }
 0x11e   :  { %v408_v23 = vadd.f32 %v406_v15, %v373_v19  ;;  %v409_v29 = vadd.f32 %v407_v18, %v374_v36 }
 0x11f   :  { %v389_v46 = vadd.f32 %v387_v20, %v354_v62  ;;  %v390_v49 = vadd.f32 %v388_v14, %v355_v13 }
 0x120   :  { %v435_v33 = vsel %vm434_vm10, %v408_v23, 0.0  ;;  %v442_v52 = vsel %vm434_vm10, %v409_v29, 0.0  ;;  %v493_v7 = vrot.slane %v408_v23, 4  ;;  %v494_v11 = vrot.slane %v409_v29, 4 }
 0x121   :  { %v436_v17 = vrot.slane %v435_v33, 4  ;;  %v443_v50 = vrot.slane %v442_v52, 4  ;;  %v424_v26 = vadd.f32 %v422_v30, %v389_v46  ;;  %v425_v25 = vadd.f32 %v423_v37, %v390_v49 }
 0x122   :  { %v497_v48 = vsel %vm434_vm10, %v493_v7, 0.0  ;;  %v504_v63 = vsel %vm434_vm10, %v494_v11, 0.0  ;;  %v396_v29 = vmul.f32 %v1741_v55, %v1547_v39  ;;  %v381_v37 = vadd.f32 %v1768_v56, %v346_v43 }
 0x123   :  { %v437_v12 = vadd.f32 %v436_v17, %v435_v33  ;;  %v444_v16 = vadd.f32 %v443_v50, %v442_v52  ;;  %v498_v58 = vrot.slane %v497_v48, 4  ;;  %v505_v22 = vrot.slane %v504_v63, 4 }
 0x124   :  { %v463_v0 = vsel %vm434_vm10, %v424_v26, 0.0  ;;  %v470_v5 = vsel %vm434_vm10, %v425_v25, 0.0  ;;  %v533_v6 = vrot.slane %v424_v26, 4  ;;  %v534_v3 = vrot.slane %v425_v25, 4 }
 0x125   :  { %v438_v24 = vrot.slane %v437_v12, 2  ;;  %v445_v44 = vrot.slane %v444_v16, 2  ;;  %v499_v41 = vadd.f32 %v498_v58, %v497_v48  ;;  %v506_v45 = vadd.f32 %v505_v22, %v504_v63  ;;  %v412_v1 = vpop.permute.xlu1 %411 }
 0x126   :  { %v464_v4 = vrot.slane %v463_v0, 4  ;;  %v471_v60 = vrot.slane %v470_v5, 4  ;;  %v537_v9 = vsel %vm434_vm10, %v533_v6, 0.0  ;;  %v544_v51 = vsel %vm434_vm10, %v534_v3, 0.0 }
 0x127   :  { %v439_v28 = vadd.f32 %v438_v24, %v437_v12  ;;  %v446_v54 = vadd.f32 %v445_v44, %v444_v16  ;;  %v500_v61 = vrot.slane %v499_v41, 2  ;;  %v507_v42 = vrot.slane %v506_v45, 2 }
 0x128   :  { %v465_v62 = vadd.f32 %v464_v4, %v463_v0  ;;  %v472_v13 = vadd.f32 %v471_v60, %v470_v5  ;;  %v538_v19 = vrot.slane %v537_v9, 4  ;;  %v545_v36 = vrot.slane %v544_v51, 4 }
 0x129   :  { %v440_v15 = vrot.slane %v439_v28, 1  ;;  %v447_v18 = vrot.slane %v446_v54, 1  ;;  %v501_v57 = vadd.f32 %v500_v61, %v499_v41  ;;  %v1796_v30 = vadd.f32 %v507_v42, %v506_v45 }
 0x12a   :  { %v466_v20 = vrot.slane %v465_v62, 2  ;;  %v473_v14 = vrot.slane %v472_v13, 2  ;;  %v539_v53 = vadd.f32 %v538_v19, %v537_v9  ;;  %v546_v23 = vadd.f32 %v545_v36, %v544_v51 }
 0x12b   :  { %v382_v46 = vadd.f32 %v1771_v2, %v347_v38  ;;  %v502_v49 = vrot.slane %v501_v57, 1  ;;  %v414_v7 = vmul.f32 %v412_v1, %v1761_v8  ;;  %v415_v11 = vmul.f32 %v412_v1, %v1765_v10 }
 0x12c   :  { %v467_v33 = vadd.f32 %v466_v20, %v465_v62  ;;  %v1800_v52 = vadd.f32 %v473_v14, %v472_v13  ;;  %v540_v27 = vrot.slane %v539_v53, 2  ;;  %v397_v17 = vadd.f32 %v1781_v47, %v362_v59 }
 0x12d   :  { %v398_v50 = vadd.f32 %v396_v29, %v363_v40  ;;  %v1805_v26 = vadd.f32 %v440_v15, %v439_v28  ;;  %v1807_v39 = vadd.f32 %v447_v18, %v446_v54  ;;  %v547_v56 = vrot.slane %v546_v23, 2 }
 0x12e   :  { %v468_v55 = vrot.slane %v467_v33, 1  ;;  %v428_v43 = vpop.permute.xlu1 %427  ;;  %v416_v2 = vadd.f32 %v414_v7, %v381_v37  ;;  %v417_v38 = vadd.f32 %v415_v11, %v382_v46  ;;  %v1811_v48 = vadd.f32 %v502_v49, %v501_v57 }
 0x12f   :  { %v430_v25 = vmul.f32 %v428_v43, %v1761_v8  ;;  %v431_v21 = vmul.f32 %v428_v43, %v1765_v10  ;;  %v509_v63 = vrot.slane %v1796_v30, 1  ;;  %v475_v47 = vrot.slane %v1800_v52, 1 }
 0x130   :  { %v1815_v59 = vadd.f32 %v540_v27, %v539_v53  ;;  %v449_v12 = vsel %vm434_vm10, %v416_v2, 0.0  ;;  %v456_v16 = vsel %vm434_vm10, %v417_v38, 0.0  ;;  %v513_v58 = vrot.slane %v416_v2, 4 }
 0x131   :  { %v514_v22 = vrot.slane %v417_v38, 4  ;;  %v450_v0 = vrot.slane %v449_v12, 4  ;;  %v457_v5 = vrot.slane %v456_v16, 4  ;;  %v432_v6 = vadd.f32 %v430_v25, %v397_v17 }
 0x132   :  { %v433_v8 = vadd.f32 %v431_v21, %v398_v50  ;;  %v469_v3 = vadd.f32 %v468_v55, %v467_v33  ;;  %v517_v10 = vsel %vm434_vm10, %v513_v58, 0.0  ;;  %v1821_v44 = vadd.f32 %v547_v56, %v546_v23 }
 0x133   :  { %v524_v24 = vsel %vm434_vm10, %v514_v22, 0.0  ;;  %v451_v41 = vadd.f32 %v450_v0, %v449_v12  ;;  %v458_v45 = vadd.f32 %v457_v5, %v456_v16  ;;  %v518_v1 = vrot.slane %v517_v10, 4 }
 0x134   :  { %v525_v4 = vrot.slane %v524_v24, 4  ;;  %v477_v60 = vsel %vm434_vm10, %v432_v6, 0.0  ;;  %v484_v9 = vsel %vm434_vm10, %v433_v8, 0.0  ;;  %v553_v51 = vrot.slane %v432_v6, 4 }
 0x135   :  { %v554_v28 = vrot.slane %v433_v8, 4  ;;  %v452_v54 = vrot.slane %v451_v41, 2  ;;  %v459_v61 = vrot.slane %v458_v45, 2  ;;  %v519_v42 = vadd.f32 %v518_v1, %v517_v10 }
 0x136   :  { %v526_v62 = vadd.f32 %v525_v4, %v524_v24  ;;  %v478_v13 = vrot.slane %v477_v60, 4  ;;  %v485_v19 = vrot.slane %v484_v9, 4  ;;  %v557_v36 = vsel %vm434_vm10, %v553_v51, 0.0 }
 0x137   :  { %v564_v40 = vsel %vm434_vm10, %v554_v28, 0.0  ;;  %v453_v15 = vadd.f32 %v452_v54, %v451_v41  ;;  %v460_v18 = vadd.f32 %v459_v61, %v458_v45  ;;  %v520_v57 = vrot.slane %v519_v42, 2 }
 0x138   :  { %v527_v20 = vrot.slane %v526_v62, 2  ;;  %v479_v14 = vadd.f32 %v478_v13, %v477_v60  ;;  %v486_v53 = vadd.f32 %v485_v19, %v484_v9  ;;  %v558_v23 = vrot.slane %v557_v36, 4 }
 0x139   :  { %v565_v29 = vrot.slane %v564_v40, 4  ;;  %v454_v37 = vrot.slane %v453_v15, 1  ;;  %v461_v46 = vrot.slane %v460_v18, 1  ;;  %v521_v49 = vadd.f32 %v520_v57, %v519_v42  ;;  %v1261_v57 = vld [vmem:[%s2271_s1 + $0x50] sm:$0xff] }
 0x13a   :  { %v528_v33 = vadd.f32 %v527_v20, %v526_v62  ;;  %v480_v27 = vrot.slane %v479_v14, 2  ;;  %v487_v7 = vrot.slane %v486_v53, 2  ;;  %v559_v11 = vadd.f32 %v558_v23, %v557_v36  ;;  %v1855_v36 = vld [vmem:[%s2272_s2] sm:$0xff] }
 0x13b   :  { %v566_v17 = vadd.f32 %v565_v29, %v564_v40  ;;  %v476_v50 = vadd.f32 %v475_v47, %v1800_v52  ;;  %v455_v55 = vadd.f32 %v454_v37, %v453_v15  ;;  %v462_v56 = vadd.f32 %v461_v46, %v460_v18  ;;  %v1260_v40 = vld [vmem:[%s2271_s1 + $0x48] sm:$0xff]  ;;  %632 = vperm.xlu1 %1314, %v1855_v36  }
 0x13c   :  { %v542_v43 = vrot.slane %v1815_v59, 1  ;;  %v481_v2 = vadd.f32 %v480_v27, %v479_v14  ;;  %v488_v38 = vadd.f32 %v487_v7, %v486_v53  ;;  %v560_v25 = vrot.slane %v559_v11, 2 }
 0x13d   :  { %v567_v21 = vrot.slane %v566_v17, 2  ;;  %v522_v12 = vrot.slane %v521_v49, 1  ;;  %v529_v16 = vrot.slane %v528_v33, 1  ;;  %v572_v58 = vsel %vm571_vm11, %v1805_v26, %v455_v55 }
 0x13e   :  { %v573_v22 = vsel %vm571_vm11, %v1807_v39, %v462_v56  ;;  %v482_v0 = vrot.slane %v481_v2, 1  ;;  %v489_v5 = vrot.slane %v488_v38, 1  ;;  %v561_v6 = vadd.f32 %v560_v25, %v559_v11  ;;  %v1262_v11 = vld [vmem:[%s2271_s1 + $0x58] sm:$0xff] }
 0x13f   :  { %v568_v52 = vadd.f32 %v567_v21, %v566_v17  ;;  %v549_v47 = vrot.slane %v1821_v44, 1  ;;  %v575_v8 = vsel %vm2286_vm12, %v572_v58, %v469_v3  ;;  %v576_v10 = vsel %vm2286_vm12, %v573_v22, %v476_v50 }
 0x140   :  { %v483_v24 = vadd.f32 %v482_v0, %v481_v2  ;;  %v490_v41 = vadd.f32 %v489_v5, %v488_v38  ;;  %v562_v45 = vrot.slane %v561_v6, 1  ;;  %v510_v26 = vadd.f32 %v509_v63, %v1796_v30  ;;  %v1264_v2 = vld [vmem:[%s2271_s1 + $0x68] sm:$0xff]  ;;  %v1265_v38 = vld [vmem:[%s2271_s1 + $0x70] sm:$0xff] }
 0x141   :  { %v569_v1 = vrot.slane %v568_v52, 1  ;;  %v523_v39 = vadd.f32 %v522_v12, %v521_v49  ;;  %v543_v4 = vadd.f32 %v542_v43, %v1815_v59  ;;  %v530_v60 = vadd.f32 %v529_v16, %v528_v33  ;;  %v1263_v43 = vld [vmem:[%s2271_s1 + $0x60] sm:$0xff] }
 0x142   :  { %v578_v9 = vsel %vm577_vm13, %v575_v8, %v483_v24  ;;  %v579_v3 = vsel %vm577_vm13, %v576_v10, %v490_v41  ;;  %v550_v51 = vadd.f32 %v549_v47, %v1821_v44  ;;  %vm2287_vm12 = vcmask 1046528  }
 0x143   :  { %v580_v28 = vsel %vm434_vm10, %v578_v9, %v1811_v48  ;;  %v581_v54 = vsel %vm434_vm10, %v579_v3, %v510_v26  ;;  %v563_v61 = vadd.f32 %v562_v45, %v561_v6  ;;  %v570_v30 = vadd.f32 %v569_v1, %v568_v52  ;;  %v1266_v45 = vld [vmem:[%s2271_s1 + $0x78] sm:$0xff] }
 0x144   :  { %v583_v63 = vsel %vm2289_vm14, %v580_v28, %v523_v39  ;;  %v584_v59 = vsel %vm2289_vm14, %v581_v54, %v530_v60  ;;  %v1392_v48 = vmov 256.0   ;;  %v2314_v14 = vmov 0  }
 0x145   :  { %v586_v42 = vsel %vm2288_vm15, %v583_v63, %v543_v4  ;;  %v587_v62 = vsel %vm2288_vm15, %v584_v59, %v550_v51  ;;  %1350 = vrcp.f32 %v1392_v48  ;;  %1315 = vset.pattern.permute.xlu1 %v2314_v14  ;;  %v2315_v29 = vmov 3  }
 0x146   :  { %v589_v13 = vsel %vm2287_vm12, %v586_v42, %v563_v61  ;;  %v590_v44 = vsel %vm2287_vm12, %v587_v62, %v570_v30  ;;  %737 = vperm.xlu1 %1315, %v1260_v40   ;;  %v2317_v7 = vmov 2   ;;  %v2318_v17 = vmov 1  }
 0x147   :  { %v591_v19 = vadd.f32 %v590_v44, %v589_v13 }
 0x149   :  { %592 = vadd.xlane.f32.xlu2 %v591_v19 }
 0x14b   :  { %v1351_v15 = vpop.eup %1350 }
 0x14c   :  { %v595_v18 = vmul.f32 256.0, %v1351_v15  ;;  %vm599_vm12 = vweird.f32 %v1351_v15 }
 0x14e   :  { %v596_v20 = vsub.f32 1.0, %v595_v18  ;;  %764 = vperm.xlu1 %1315, %v1261_v57  }
 0x150   :  { %v597_v53 = vmul.f32 %v1351_v15, %v596_v20 }
 0x152   :  { %v598_v23 = vadd.f32 %v1351_v15, %v597_v53 }
 0x154   :  { %v1866_v37 = vsel %vm599_vm12, %v1351_v15, %v598_v23 }
 0x155   :  { %2316 = vst [vmem:[#allocation7_spill] sm:$0xff] %v1866_v37 }
 0x156   :  { %1317 = vset.pattern.permute.xlu1 %v2317_v7 }
 0x157   :  { %780 = vperm.xlu1 %1317, %v1261_v57  }
 0x15f   :  { %1319 = vset.pattern.permute.xlu1 %v2314_v14 }
 0x160   :  { %799 = vperm.xlu1 %1319, %v1262_v11  }
 0x161   :  { %743 = vperm.xlu2 %1316, %v1260_v40  }
 0x168   :  { %1321 = vset.pattern.permute.xlu1 %v2317_v7 }
 0x169   :  { %772 = vperm.xlu2 %1316, %v1261_v57   ;;  %815 = vperm.xlu1 %1321, %v1262_v11  }
 0x171   :  { %1318 = vset.pattern.permute.xlu2 %v2315_v29  ;;  %1323 = vset.pattern.permute.xlu1 %v2318_v17 }
 0x172   :  { %755 = vperm.xlu2 %1318, %v1260_v40   ;;  %842 = vperm.xlu1 %1323, %v1263_v43  }
 0x17a   :  { %1320 = vset.pattern.permute.xlu2 %v2318_v17  ;;  %1325 = vset.pattern.permute.xlu1 %v2315_v29 }
 0x17b   :  { %807 = vperm.xlu2 %1320, %v1262_v11   ;;  %858 = vperm.xlu1 %1325, %v1263_v43  }
 0x183   :  { %1322 = vset.pattern.permute.xlu2 %v2315_v29  ;;  %1329 = vset.pattern.permute.xlu1 %v2317_v7 }
 0x184   :  { %823 = vperm.xlu2 %1322, %v1262_v11   ;;  %885 = vperm.xlu1 %1329, %v1264_v2  }
 0x18c   :  { %1324 = vset.pattern.permute.xlu2 %v2317_v7  ;;  %1331 = vset.pattern.permute.xlu1 %v2314_v14 }
 0x18d   :  { %850 = vperm.xlu2 %1324, %v1263_v43   ;;  %904 = vperm.xlu1 %1331, %v1265_v38  }
 0x195   :  { %1326 = vset.pattern.permute.xlu2 %v2314_v14  ;;  %1334 = vset.pattern.permute.xlu1 %v2315_v29 }
 0x196   :  { %869 = vperm.xlu2 %1326, %v1264_v2   ;;  %928 = vperm.xlu1 %1334, %v1265_v38  }
 0x19e   :  { %1330 = vset.pattern.permute.xlu2 %v2315_v29  ;;  %1335 = vset.pattern.permute.xlu1 %v2314_v14 }
 0x19f   :  { %893 = vperm.xlu2 %1330, %v1264_v2  }
 0x1a7   :  { %1332 = vset.pattern.permute.xlu2 %v2318_v17 }
 0x1a8   :  { %912 = vperm.xlu2 %1332, %v1265_v38  }
 0x1ad   :  { %v633_v8 = vpop.permute.xlu1 %632 }
 0x1b0   :  { %1336 = vset.pattern.permute.xlu2 %v2314_v14 }
 0x1b8   :  { %v1910_v10 = vpop.permute.xlu1 %737 }
 0x1bc   :  { %v593_v46 = vpop.xlane.xlu2 %592 }
 0x1bd   :  { %v601_v49 = vmul.f32 %v1866_v37, %v593_v46 }
 0x1bf   :  { %v1869_v33 = vsub.f32 %v589_v13, %v601_v49  ;;  %v1871_v27 = vsub.f32 %v590_v44, %v601_v49 }
 0x1c0   :  { %v1912_v24 = vpop.permute.xlu1 %764 }
 0x1c1   :  { %v604_v50 = vmul.f32 %v1869_v33, %v1869_v33  ;;  %v605_v55 = vmul.f32 %v1871_v27, %v1871_v27 }
 0x1c3   :  { %v606_v56 = vadd.f32 %v605_v55, %v604_v50 }
 0x1c4   :  { %v1922_v26 = vpop.permute.xlu2 %743 }
 0x1c5   :  { %607 = vadd.xlane.f32.xlu0 %v606_v56 }
 0x1c9   :  { %v1914_v41 = vpop.permute.xlu1 %780 }
 0x1cc   :  { %v1926_v4 = vpop.permute.xlu2 %772 }
 0x1d2   :  { %v1919_v1 = vpop.permute.xlu1 %799 }
 0x1d4   :  { %v1930_v9 = vpop.permute.xlu2 %755 }
 0x1d9   :  { %877 = vperm.xlu0 %1327, %v1264_v2  }
 0x1db   :  { %v1924_v39 = vpop.permute.xlu1 %815 }
 0x1dc   :  { %v1934_v51 = vpop.permute.xlu2 %807 }
 0x1e1   :  { %1328 = vset.pattern.permute.xlu0 %v2317_v7 }
 0x1e2   :  { %749 = vperm.xlu0 %1328, %v1260_v40  }
 0x1e4   :  { %v1928_v60 = vpop.permute.xlu1 %842  ;;  %v1936_v54 = vpop.permute.xlu2 %823 }
 0x1ea   :  { %920 = vperm.xlu0 %1328, %v1265_v38  }
 0x1ec   :  { %v1940_v30 = vpop.permute.xlu2 %850 }
 0x1ed   :  { %v1932_v3 = vpop.permute.xlu1 %858 }
 0x1f2   :  { %1333 = vset.pattern.permute.xlu0 %v2315_v29 }
 0x1f3   :  { %788 = vperm.xlu0 %1333, %v1261_v57  }
 0x1f4   :  { %v870_v59 = vpop.permute.xlu2 %869 }
 0x1f6   :  { %v886_v28 = vpop.permute.xlu1 %885 }
 0x1fb   :  { %963 = vperm.xlu0 %1333, %v1266_v45  }
 0x1ff   :  { %v1938_v61 = vpop.permute.xlu1 %904 }
 0x203   :  { %1339 = vset.pattern.permute.xlu0 %v2314_v14 }
 0x204   :  { %834 = vperm.xlu0 %1339, %v1263_v43  }
 0x208   :  { %v1942_v63 = vpop.permute.xlu1 %928 }
 0x209   :  { %2319 = vst [vmem:[#allocation8_spill] sm:$0xff] %v1942_v63 }
 0x238   :  { %v608_v25 = vpop.xlane.xlu0 %607 }
 0x239   :  { %v609_v21 = vmul.f32 %v608_v25, %v1866_v37 }
 0x23b   :  { %v611_v12 = vadd.f32 1e-05, %v609_v21 }
 0x23d   :  { %1352 = vrsqrt.f32 %v611_v12  ;;  %vm618_vm15 = vweird.f32 %v611_v12 }
 0x243   :  { %v1353_v16 = vpop.eup %1352 }
 0x244   :  { %v613_v58 = vmul.f32 %v1353_v16, %v611_v12  ;;  %vm619_vm12 = vweird.f32 %v1353_v16 }
 0x245   :  { %vm620_vm14 = vmor %vm618_vm15, %vm619_vm12 }
 0x246   :  { %v614_v22 = vmul.f32 %v1353_v16, %v613_v58 }
 0x248   :  { %v615_v0 = vmul.f32 0.5, %v614_v22 }
 0x24a   :  { %v616_v5 = vsub.f32 1.5, %v615_v0  ;;  %v1268_v0 = vld [vmem:[%s2271_s1 + $0x88] sm:$0xff] }
 0x24b   :  { %v878_v48 = vpop.permute.xlu0 %877 }
 0x24c   :  { %v617_v6 = vmul.f32 %v1353_v16, %v616_v5 }
 0x24e   :  { %v621_v52 = vsel %vm620_vm14, %v1353_v16, %v617_v6 }
 0x24f   :  { %v622_v47 = vmul.f32 %v621_v52, %v1855_v36  ;;  %v894_v36 = vpop.permute.xlu2 %893 }
 0x251   :  { %625 = vperm.xlu1 %1335, %v622_v47  }
 0x257   :  { %v1978_v50 = vpop.permute.xlu2 %912 }
 0x259   :  { %1337 = vset.pattern.permute.xlu1 %v2318_v17 }
 0x2c3   :  { %v626_v42 = vpop.permute.xlu1 %625 }
 0x2c4   :  { %v628_v62 = vmul.f32 %v626_v42, %v1869_v33  ;;  %v629_v13 = vmul.f32 %v626_v42, %v1871_v27  ;;  %v1267_v27 = vld [vmem:[%s2271_s1 + $0x80] sm:$0xff] }
 0x2c6   :  { %v635_v44 = vadd.f32 %v633_v8, %v628_v62  ;;  %v636_v19 = vadd.f32 %v633_v8, %v629_v13 }
 0x2c8   :  { %v637_v40 = vmax.f32 %v635_v44, 0.0  ;;  %v638_v15 = vmax.f32 %v636_v19, 0.0 }
 0x2ca   :  { %v1946_v18 = vmul.f32 %v878_v48, %v637_v40  ;;  %v1948_v57 = vmul.f32 %v878_v48, %v638_v15  ;;  %v1950_v20 = vmul.f32 %v894_v36, %v637_v40  ;;  %v1952_v53 = vmul.f32 %v894_v36, %v638_v15  ;;  %690 = vrot.lane.b32.xlu0 %v637_v40, %s1384_s16 }
 0x2cb   :  { %653 = vrot.lane.b32.xlu2 %v637_v40, %s1385_s17  ;;  %641 = vrot.lane.b32.xlu1 %v637_v40, %s1386_s18  ;;  %v1957_v23 = vmul.f32 %v870_v59, %v637_v40  ;;  %v1959_v46 = vmul.f32 %v870_v59, %v638_v15  ;;  %v1961_v49 = vmul.f32 %v886_v28, %v637_v40 }
 0x2cc   :  { %v1963_v33 = vmul.f32 %v886_v28, %v638_v15 }
 0x2d3   :  { %939 = vperm.xlu2 %1336, %v1266_v45   ;;  %643 = vrot.lane.b32.xlu1 %v638_v15, %s1386_s18 }
 0x2db   :  { %1338 = vset.pattern.permute.xlu2 %v2317_v7  ;;  %650 = vrot.lane.b32.xlu1 %v638_v15, %s1385_s17 }
 0x2dc   :  { %955 = vperm.xlu2 %1338, %v1266_v45  }
 0x2e3   :  { %947 = vperm.xlu1 %1337, %v1266_v45  }
 0x2e4   :  { %1341 = vset.pattern.permute.xlu2 %v2318_v17 }
 0x2e5   :  { %982 = vperm.xlu2 %1341, %v1267_v27  }
 0x2eb   :  { %1340 = vset.pattern.permute.xlu1 %v2314_v14 }
 0x2ec   :  { %974 = vperm.xlu1 %1340, %v1267_v27  }
 0x2ed   :  { %687 = vrot.lane.b32.xlu2 %v638_v15, %s1384_s16 }
 0x2ee   :  { %1343 = vset.pattern.permute.xlu2 %v2315_v29 }
 0x2f4   :  { %696 = vrot.lane.b32.xlu1 %v637_v40, %s1389_s19 }
 0x2f5   :  { %698 = vrot.lane.b32.xlu2 %v638_v15, %s1389_s19  ;;  %1342 = vset.pattern.permute.xlu1 %v2317_v7 }
 0x325   :  { %v654_v43 = vpop.permute.xlu2 %653 }
 0x32d   :  { %v940_v52 = vpop.permute.xlu2 %939 }
 0x336   :  { %v2019_v45 = vpop.permute.xlu2 %955 }
 0x33d   :  { %v642_v11 = vpop.permute.xlu1 %641 }
 0x33f   :  { %v2021_v42 = vpop.permute.xlu2 %982 }
 0x340   :  { %2325 = vst [vmem:[#allocation10_spill] sm:$0xff] %v2021_v42 }
 0x345   :  { %v644_v55 = vpop.permute.xlu1 %643 }
 0x346   :  { %v1981_v56 = vsel %vm36_vm1, %v642_v11, %v644_v55  ;;  %v649_v16 = vsel %vm36_vm1, %v644_v55, %v642_v11 }
 0x347   :  { %2320 = vst [vmem:[#allocation9_spill] sm:$0xff] %v1981_v56  ;;  %720 = vrot.lane.b32.xlu2 %v1981_v56, %s1389_s19  ;;  %v688_v13 = vpop.permute.xlu2 %687 }
 0x34d   :  { %v651_v2 = vpop.permute.xlu1 %650 }
 0x34e   :  { %v655_v38 = vsel %vm47_vm0, %v654_v43, %v651_v2  ;;  %v658_v25 = vsel %vm47_vm0, %v651_v2, %v654_v43  ;;  %vm2347_vm0 = vcmask 1041408  }
 0x34f   :  { %v659_v12 = vsel %vm26_vm2, %v1981_v56, %v658_v25  ;;  %998 = vperm.xlu2 %1343, %v1267_v27   ;;  %664 = vrot.lane.b32.xlu1 %v655_v38, %s1384_s16  ;;  %v1996_v22 = vsel %vm29_vm4, %v655_v38, %v649_v16  ;;  %v768_v25 = vmul.f32 %v1912_v24, %v655_v38  ;;  %vm2348_vm1 = vmmov %vm2347_vm0  ;;  %vm2349_vm2 = vcmask 1044480  }
 0x350   :  { %668 = vrot.lane.b32.xlu0 %v659_v12, %s1384_s16  ;;  %2323 = vst [vmem:[#allocation5_spill] sm:$0xff] %v1996_v22  ;;  %v767_v55 = vmul.f32 %v1912_v24, %v659_v12  ;;  %v775_v43 = vmul.f32 %v1926_v4, %v659_v12  ;;  %v783_v2 = vmul.f32 %v1914_v41, %v659_v12  ;;  %vm2351_vm4 = vcmask 1045504  }
 0x351   :  { %v784_v24 = vmul.f32 %v1914_v41, %v655_v38 }
 0x355   :  { %v2015_v47 = vpop.permute.xlu1 %947 }
 0x357   :  { %676 = vrot.lane.b32.xlu1 %v655_v38, %s1389_s19  ;;  %1345 = vset.pattern.permute.xlu2 %v2317_v7  ;;  %v2012_v7 = vpop.permute.xlu0 %749 }
 0x358   :  { %710 = vrot.lane.b32.xlu0 %v1996_v22, %s1384_s16  ;;  %1025 = vperm.xlu2 %1345, %v1268_v0  }
 0x35e   :  { %v975_v28 = vpop.permute.xlu1 %974 }
 0x35f   :  { %714 = vrot.lane.b32.xlu1 %v1981_v56, %s1384_s16  ;;  %v921_v5 = vpop.permute.xlu0 %920 }
 0x360   :  { %722 = vrot.lane.b32.xlu0 %v1996_v22, %s1389_s19 }
 0x366   :  { %v697_v62 = vpop.permute.xlu1 %696 }
 0x367   :  { %674 = vrot.lane.b32.xlu1 %v659_v12, %s1389_s19  ;;  %v789_v6 = vpop.permute.xlu0 %788 }
 0x368   :  { %1009 = vperm.xlu0 %1339, %v1268_v0   ;;  %v792_v37 = vmul.f32 %v789_v6, %v655_v38 }
 0x36f   :  { %990 = vperm.xlu1 %1342, %v1267_v27   ;;  %v2017_v8 = vpop.permute.xlu0 %963 }
 0x370   :  { %1349 = vset.pattern.permute.xlu0 %v2318_v17  ;;  %2324 = vst [vmem:[#allocation6_spill] sm:$0xff] %v2017_v8 }
 0x377   :  { %1344 = vset.pattern.permute.xlu1 %v2318_v17  ;;  %v835_v59 = vpop.permute.xlu0 %834 }
 0x378   :  { %1017 = vperm.xlu1 %1344, %v1268_v0  }
 0x380   :  { %1346 = vset.pattern.permute.xlu1 %v2315_v29  ;;  %v691_v29 = vpop.permute.xlu0 %690 }
 0x381   :  { %1033 = vperm.xlu1 %1346, %v1268_v0   ;;  %v692_v27 = vsel %vm63_vm5, %v691_v29, %v688_v13  ;;  %v695_v11 = vsel %vm63_vm5, %v688_v13, %v691_v29  ;;  %v791_v0 = vmul.f32 %v789_v6, %v659_v12  ;;  %v2037_v29 = vmul.f32 %v975_v28, %v1981_v56 }
 0x382   :  { %v2040_v13 = vmul.f32 %v975_v28, %v1996_v22 }
 0x383   :  { %2326 = vst [vmem:[#allocation11_spill] sm:$0xff] %v2037_v29 }
 0x384   :  { %2327 = vst [vmem:[#allocation12_spill] sm:$0xff] %v2040_v13 }
 0x389   :  { %1347 = vset.pattern.permute.xlu1 %v2314_v14  ;;  %v699_v14 = vpop.permute.xlu2 %698 }
 0x38a   :  { %v700_v40 = vsel %vm72_vm3, %v697_v62, %v699_v14  ;;  %v704_v15 = vsel %vm72_vm3, %v699_v14, %v697_v62  ;;  %v776_v62 = vmul.f32 %v1926_v4, %v655_v38 }
 0x38b   :  { %v705_v21 = vsel %vm1534_vm8, %v700_v40, %v695_v11  ;;  %v706_v16 = vsel %vm1526_vm6, %v704_v15, %v692_v27  ;;  %v2049_v4 = vsel %vm1538_vm9, %v695_v11, %v700_v40  ;;  %v2053_v28 = vsel %vm1530_vm7, %v692_v27, %v704_v15 }
 0x38c   :  { %2328 = vst [vmem:[#allocation13_spill] sm:$0xff] %v2049_v4  ;;  %v2055_v13 = vmul.f32 %v835_v59, %v705_v21  ;;  %v2057_v41 = vmul.f32 %v835_v59, %v706_v16  ;;  %v2060_v38 = vmul.f32 %v1928_v60, %v705_v21  ;;  %v2063_v6 = vmul.f32 %v1928_v60, %v706_v16 }
 0x38d   :  { %2329 = vst [vmem:[#allocation14_spill] sm:$0xff] %v2053_v28  ;;  %v2072_v40 = vmul.f32 %v1932_v3, %v705_v21  ;;  %v2075_v15 = vmul.f32 %v1932_v3, %v706_v16  ;;  %v2087_v27 = vmul.f32 %v1938_v61, %v2049_v4  ;;  %v2095_v3 = vmul.f32 %v1978_v50, %v2049_v4 }
 0x38e   :  { %v2099_v11 = vmul.f32 %v1978_v50, %v2053_v28 }
 0x3a1   :  { %v721_v14 = vpop.permute.xlu2 %720 }
 0x3c1   :  { %v665_v44 = vpop.permute.xlu1 %664 }
 0x3c2   :  { %v669_v19 = vpop.permute.xlu0 %668 }
 0x3c9   :  { %v677_v48 = vpop.permute.xlu1 %676 }
 0x3ca   :  { %v711_v36 = vpop.permute.xlu0 %710 }
 0x3d1   :  { %v715_v58 = vpop.permute.xlu1 %714 }
 0x3d2   :  { %v723_v17 = vpop.permute.xlu0 %722  ;;  %v716_v8 = vsel %vm63_vm5, %v715_v58, %v711_v36  ;;  %v719_v63 = vsel %vm63_vm5, %v711_v36, %v715_v58  ;;  %v2069_v36 = vmul.f32 %v1940_v30, %v706_v16  ;;  %v2105_v16 = vmul.f32 %v921_v5, %v2053_v28 }
 0x3d3   :  { %v724_v42 = vsel %vm72_vm3, %v721_v14, %v723_v17  ;;  %v728_v12 = vsel %vm72_vm3, %v723_v17, %v721_v14  ;;  %v2066_v17 = vmul.f32 %v1940_v30, %v705_v21  ;;  %v2091_v30 = vmul.f32 %v1938_v61, %v2053_v28 }
 0x3d4   :  { %v2079_v59 = vsel %vm1534_vm8, %v724_v42, %v719_v63  ;;  %v2083_v60 = vsel %vm1526_vm6, %v728_v12, %v716_v8  ;;  %v2102_v21 = vmul.f32 %v921_v5, %v2049_v4  ;;  %2331 = vst [vmem:[#allocation16_spill] sm:$0xff] %v2105_v16  ;;  %v670_v58 = vsel %vm63_vm5, %v669_v19, %v665_v44 }
 0x3d5   :  { %v673_v14 = vsel %vm63_vm5, %v665_v44, %v669_v19  ;;  %v2111_v61 = vsel %vm1538_vm9, %v719_v63, %v724_v42  ;;  %v2115_v29 = vsel %vm1530_vm7, %v716_v8, %v728_v12  ;;  %v2118_v50 = vmul.f32 %v940_v52, %v2079_v59  ;;  %vm2352_vm5 = vmmov %vm2351_vm4 }
 0x3d6   :  { %2330 = vst [vmem:[#allocation15_spill] sm:$0xff] %v2102_v21  ;;  %v2121_v4 = vmul.f32 %v940_v52, %v2083_v60  ;;  %v2125_v28 = vmul.f32 %v2015_v47, %v2079_v59  ;;  %v2129_v44 = vmul.f32 %v2015_v47, %v2083_v60 }
 0x3d8   :  { %2332 = vst [vmem:[#allocation17_spill] sm:$0xff] %v2125_v28 }
 0x3d9   :  { %v675_v5 = vpop.permute.xlu1 %674  ;;  %2333 = vst [vmem:[#allocation18_spill] sm:$0xff] %v2129_v44 }
 0x3da   :  { %v678_v63 = vsel %vm72_vm3, %v675_v5, %v677_v48  ;;  %v682_v8 = vsel %vm72_vm3, %v677_v48, %v675_v5  ;;  %vm2350_vm3 = vmmov %vm2349_vm2 }
 0x3db   :  { %v683_v42 = vsel %vm1534_vm8, %v678_v63, %v673_v14  ;;  %v684_v52 = vsel %vm1526_vm6, %v682_v8, %v670_v58  ;;  %v685_v19 = vsel %vm1538_vm9, %v673_v14, %v678_v63  ;;  %v686_v12 = vsel %vm1530_vm7, %v670_v58, %v682_v8 }
 0x3dc   :  { %v740_v28 = vmul.f32 %v1910_v10, %v683_v42  ;;  %v741_v47 = vmul.f32 %v1910_v10, %v684_v52  ;;  %v746_v44 = vmul.f32 %v1922_v26, %v683_v42  ;;  %v747_v48 = vmul.f32 %v1922_v26, %v684_v52 }
 0x3dd   :  { %v752_v34 = vmul.f32 %v2012_v7, %v683_v42  ;;  %v753_v5 = vmul.f32 %v2012_v7, %v684_v52  ;;  %v758_v31 = vmul.f32 %v1930_v9, %v683_v42  ;;  %v759_v35 = vmul.f32 %v1930_v9, %v684_v52 }
 0x3de   :  { %v769_v14 = vadd.f32 %v767_v55, %v740_v28  ;;  %v770_v63 = vadd.f32 %v768_v25, %v741_v47  ;;  %v777_v32 = vadd.f32 %v775_v43, %v746_v44  ;;  %v778_v58 = vadd.f32 %v776_v62, %v747_v48 }
 0x3df   :  { %v785_v8 = vadd.f32 %v783_v2, %v752_v34  ;;  %v786_v22 = vadd.f32 %v784_v24, %v753_v5  ;;  %v793_v56 = vadd.f32 %v791_v0, %v758_v31  ;;  %v794_v10 = vadd.f32 %v792_v37, %v759_v35  ;;  %v2157_v2 = vpop.permute.xlu2 %998 }
 0x3e0   :  { %v802_v16 = vmul.f32 %v1919_v1, %v685_v19  ;;  %v803_v26 = vmul.f32 %v1919_v1, %v686_v12  ;;  %v810_v21 = vmul.f32 %v1934_v51, %v685_v19  ;;  %v811_v7 = vmul.f32 %v1934_v51, %v686_v12 }
 0x3e1   :  { %v818_v42 = vmul.f32 %v1924_v39, %v685_v19  ;;  %v819_v9 = vmul.f32 %v1924_v39, %v686_v12  ;;  %v826_v55 = vmul.f32 %v1936_v54, %v685_v19  ;;  %v827_v43 = vmul.f32 %v1936_v54, %v686_v12  ;;  %v991_v24 = vpop.permute.xlu1 %990  ;;  %v1010_v54 = vpop.permute.xlu0 %1009 }
 0x3e2   :  { %v804_v25 = vadd.f32 %v802_v16, %v769_v14  ;;  %v805_v37 = vadd.f32 %v803_v26, %v770_v63  ;;  %v812_v0 = vadd.f32 %v810_v21, %v777_v32  ;;  %v813_v62 = vadd.f32 %v811_v7, %v778_v58 }
 0x3e3   :  { %v820_v1 = vadd.f32 %v818_v42, %v785_v8  ;;  %v821_v28 = vadd.f32 %v819_v9, %v786_v22  ;;  %v828_v44 = vadd.f32 %v826_v55, %v793_v56  ;;  %v829_v52 = vadd.f32 %v827_v43, %v794_v10  ;;  %v2342_v43 = vld [vmem:[#allocation10_spill] sm:$0xff] }
 0x3e4   :  { %v839_v51 = vadd.f32 %v2055_v13, %v804_v25  ;;  %v840_v47 = vadd.f32 %v2057_v41, %v805_v37  ;;  %v847_v39 = vadd.f32 %v2060_v38, %v812_v0  ;;  %v848_v19 = vadd.f32 %v2063_v6, %v813_v62 }
 0x3e5   :  { %v863_v12 = vadd.f32 %v2072_v40, %v828_v44  ;;  %v864_v16 = vadd.f32 %v2075_v15, %v829_v52  ;;  %v958_v21 = vmul.f32 %v2019_v45, %v2079_v59  ;;  %v959_v56 = vmul.f32 %v2019_v45, %v2083_v60 }
 0x3e6   :  { %v874_v22 = vadd.f32 %v1957_v23, %v839_v51  ;;  %v875_v13 = vadd.f32 %v1959_v46, %v840_v47  ;;  %v855_v41 = vadd.f32 %v2066_v17, %v820_v1  ;;  %v856_v38 = vadd.f32 %v2069_v36, %v821_v28 }
 0x3e7   :  { %v1012_v6 = vmul.f32 %v1010_v54, %v2111_v61  ;;  %v1013_v40 = vmul.f32 %v1010_v54, %v2115_v29  ;;  %v882_v15 = vadd.f32 %v1946_v18, %v847_v39  ;;  %v883_v48 = vadd.f32 %v1948_v57, %v848_v19  ;;  %v1026_v35 = vpop.permute.xlu2 %1025 }
 0x3e8   :  { %v909_v34 = vadd.f32 %v2087_v27, %v874_v22  ;;  %v910_v45 = vadd.f32 %v2091_v30, %v875_v13  ;;  %v890_v23 = vadd.f32 %v1961_v49, %v855_v41  ;;  %v891_v46 = vadd.f32 %v1963_v33, %v856_v38  ;;  %v2334_v27 = vld [vmem:[#allocation15_spill] sm:$0xff]  ;;  %v2335_v30 = vld [vmem:[#allocation16_spill] sm:$0xff]  ;;  %v2336_v49 = vld [vmem:[#allocation9_spill] sm:$0xff] }
 0x3e9   :  { %v917_v17 = vadd.f32 %v2095_v3, %v882_v15  ;;  %v918_v36 = vadd.f32 %v2099_v11, %v883_v48  ;;  %v898_v5 = vadd.f32 %v1950_v20, %v863_v12  ;;  %v899_v31 = vadd.f32 %v1952_v53, %v864_v16  ;;  %v2337_v33 = vld [vmem:[#allocation5_spill] sm:$0xff]  ;;  %v2339_v11 = vld [vmem:[#allocation18_spill] sm:$0xff]  ;;  %v2340_v20 = vld [vmem:[#allocation11_spill] sm:$0xff] }
 0x3ea   :  { %v944_v18 = vadd.f32 %v2118_v50, %v909_v34  ;;  %v945_v57 = vadd.f32 %v2121_v4, %v910_v45  ;;  %v925_v14 = vadd.f32 %v2334_v27, %v890_v23  ;;  %v926_v63 = vadd.f32 %v2335_v30, %v891_v46  ;;  %v2338_v3 = vld [vmem:[#allocation17_spill] sm:$0xff]  ;;  %v2341_v53 = vld [vmem:[#allocation12_spill] sm:$0xff]  ;;  %v1018_v9 = vpop.permute.xlu1 %1017  ;;  %v2345_v38 = vld [vmem:[#allocation14_spill] sm:$0xff] }
 0x3eb   :  { %v993_v32 = vmul.f32 %v991_v24, %v2336_v49  ;;  %v994_v58 = vmul.f32 %v991_v24, %v2337_v33  ;;  %v952_v8 = vadd.f32 %v2338_v3, %v917_v17  ;;  %v953_v10 = vadd.f32 %v2339_v11, %v918_v36  ;;  %v2343_v22 = vld [vmem:[#allocation13_spill] sm:$0xff]  ;;  %v2344_v13 = vld [vmem:[#allocation8_spill] sm:$0xff] }
 0x3ec   :  { %v979_v26 = vadd.f32 %v2340_v20, %v944_v18  ;;  %v980_v7 = vadd.f32 %v2341_v53, %v945_v57  ;;  %v960_v42 = vadd.f32 %v958_v21, %v925_v14  ;;  %v961_v50 = vadd.f32 %v959_v56, %v926_v63  ;;  %v2346_v53 = vld [vmem:[#allocation6_spill] sm:$0xff] }
 0x3ed   :  { %v1028_v4 = vmul.f32 %v1026_v35, %v2111_v61  ;;  %v1029_v55 = vmul.f32 %v1026_v35, %v2115_v29  ;;  %v985_v25 = vmul.f32 %v2342_v43, %v2336_v49  ;;  %v986_v37 = vmul.f32 %v2342_v43, %v2337_v33 }
 0x3ee   :  { %v1014_v0 = vadd.f32 %v1012_v6, %v979_v26  ;;  %v1015_v62 = vadd.f32 %v1013_v40, %v980_v7  ;;  %v995_v24 = vadd.f32 %v993_v32, %v960_v42  ;;  %v996_v1 = vadd.f32 %v994_v58, %v961_v50 }
 0x3ef   :  { %v987_v28 = vadd.f32 %v985_v25, %v952_v8  ;;  %v988_v44 = vadd.f32 %v986_v37, %v953_v10  ;;  %v1020_v52 = vmul.f32 %v1018_v9, %v2111_v61  ;;  %v1021_v51 = vmul.f32 %v1018_v9, %v2115_v29 }
 0x3f0   :  { %v1040_v47 = vsel %vm434_vm10, %v1014_v0, 0.0  ;;  %v1047_v39 = vsel %vm434_vm10, %v1015_v62, 0.0  ;;  %v1098_v19 = vrot.slane %v1014_v0, 4  ;;  %v1099_v54 = vrot.slane %v1015_v62, 4 }
 0x3f1   :  { %v1041_v12 = vrot.slane %v1040_v47, 4  ;;  %v1048_v16 = vrot.slane %v1047_v39, 4  ;;  %v1030_v21 = vadd.f32 %v1028_v4, %v995_v24  ;;  %v1031_v56 = vadd.f32 %v1029_v55, %v996_v1 }
 0x3f2   :  { %v931_v41 = vmul.f32 %v2344_v13, %v2343_v22  ;;  %v932_v6 = vmul.f32 %v2344_v13, %v2345_v38  ;;  %v1102_v40 = vsel %vm434_vm10, %v1098_v19, 0.0  ;;  %v1109_v15 = vsel %vm434_vm10, %v1099_v54, 0.0 }
 0x3f3   :  { %v1042_v48 = vadd.f32 %v1041_v12, %v1040_v47  ;;  %v1049_v34 = vadd.f32 %v1048_v16, %v1047_v39  ;;  %v1103_v45 = vrot.slane %v1102_v40, 4  ;;  %v1110_v23 = vrot.slane %v1109_v15, 4 }
 0x3f4   :  { %v1068_v46 = vsel %vm434_vm10, %v1030_v21, 0.0  ;;  %v1075_v17 = vsel %vm434_vm10, %v1031_v56, 0.0  ;;  %v1138_v36 = vrot.slane %v1030_v21, 4  ;;  %v1139_v35 = vrot.slane %v1031_v56, 4 }
 0x3f5   :  { %v1043_v18 = vrot.slane %v1042_v48, 2  ;;  %v1050_v57 = vrot.slane %v1049_v34, 2  ;;  %v1022_v27 = vadd.f32 %v1020_v52, %v987_v28  ;;  %v1023_v14 = vadd.f32 %v1021_v51, %v988_v44 }
 0x3f6   :  { %v1104_v30 = vadd.f32 %v1103_v45, %v1102_v40  ;;  %v1111_v63 = vadd.f32 %v1110_v23, %v1109_v15  ;;  %v1069_v32 = vrot.slane %v1068_v46, 4  ;;  %v1076_v58 = vrot.slane %v1075_v17, 4 }
 0x3f7   :  { %v933_v3 = vadd.f32 %v931_v41, %v898_v5  ;;  %v934_v8 = vadd.f32 %v932_v6, %v899_v31  ;;  %v1142_v20 = vsel %vm434_vm10, %v1138_v36, 0.0  ;;  %v1149_v26 = vsel %vm434_vm10, %v1139_v35, 0.0 }
 0x3f8   :  { %v1070_v11 = vadd.f32 %v1069_v32, %v1068_v46  ;;  %v1077_v10 = vadd.f32 %v1076_v58, %v1075_v17  ;;  %v966_v7 = vmul.f32 %v2346_v53, %v2079_v59  ;;  %v967_v42 = vmul.f32 %v2346_v53, %v2083_v60 }
 0x3f9   :  { %v1044_v50 = vadd.f32 %v1043_v18, %v1042_v48  ;;  %v1051_v9 = vadd.f32 %v1050_v57, %v1049_v34  ;;  %v1105_v4 = vrot.slane %v1104_v30, 2  ;;  %v1112_v55 = vrot.slane %v1111_v63, 2 }
 0x3fa   :  { %v1054_v43 = vsel %vm434_vm10, %v1022_v27, 0.0  ;;  %v1061_v5 = vsel %vm434_vm10, %v1023_v14, 0.0  ;;  %v1001_v31 = vmul.f32 %v2157_v2, %v2336_v49  ;;  %v1002_v25 = vmul.f32 %v2157_v2, %v2337_v33  ;;  %v1034_v33 = vpop.permute.xlu1 %1033 }
 0x3fb   :  { %v1143_v37 = vrot.slane %v1142_v20, 4  ;;  %v1150_v0 = vrot.slane %v1149_v26, 4  ;;  %v1071_v59 = vrot.slane %v1070_v11, 2  ;;  %v1078_v62 = vrot.slane %v1077_v10, 2 }
 0x3fc   :  { %v968_v24 = vadd.f32 %v966_v7, %v933_v3  ;;  %v969_v60 = vadd.f32 %v967_v42, %v934_v8  ;;  %v1045_v1 = vrot.slane %v1044_v50, 1  ;;  %v1052_v28 = vrot.slane %v1051_v9, 1 }
 0x3fd   :  { %v1055_v44 = vrot.slane %v1054_v43, 4  ;;  %v1062_v52 = vrot.slane %v1061_v5, 4  ;;  %v2225_v51 = vadd.f32 %v1105_v4, %v1104_v30  ;;  %v2227_v47 = vadd.f32 %v1112_v55, %v1111_v63 }
 0x3fe   :  { %v1118_v39 = vrot.slane %v1022_v27, 4  ;;  %v1119_v19 = vrot.slane %v1023_v14, 4  ;;  %v1144_v49 = vadd.f32 %v1143_v37, %v1142_v20  ;;  %v1151_v54 = vadd.f32 %v1150_v0, %v1149_v26 }
 0x3ff   :  { %v1056_v12 = vadd.f32 %v1055_v44, %v1054_v43  ;;  %v1063_v2 = vadd.f32 %v1062_v52, %v1061_v5  ;;  %v1072_v16 = vadd.f32 %v1071_v59, %v1070_v11  ;;  %v1079_v21 = vadd.f32 %v1078_v62, %v1077_v10 }
 0x400   :  { %v1122_v56 = vsel %vm434_vm10, %v1118_v39, 0.0  ;;  %v1129_v22 = vsel %vm434_vm10, %v1119_v19, 0.0  ;;  %v1003_v40 = vadd.f32 %v1001_v31, %v968_v24  ;;  %v1004_v15 = vadd.f32 %v1002_v25, %v969_v60 }
 0x401   :  { %v1057_v13 = vrot.slane %v1056_v12, 2  ;;  %v1064_v41 = vrot.slane %v1063_v2, 2  ;;  %v1123_v38 = vrot.slane %v1122_v56, 4  ;;  %v1130_v6 = vrot.slane %v1129_v22, 4 }
 0x402   :  { %v1036_v48 = vmul.f32 %v1034_v33, %v2111_v61  ;;  %v1037_v34 = vmul.f32 %v1034_v33, %v2115_v29  ;;  %v1046_v36 = vadd.f32 %v1045_v1, %v1044_v50  ;;  %v1053_v35 = vadd.f32 %v1052_v28, %v1051_v9 }
 0x403   :  { %v1058_v45 = vadd.f32 %v1057_v13, %v1056_v12  ;;  %v1065_v23 = vadd.f32 %v1064_v41, %v1063_v2  ;;  %v1124_v46 = vadd.f32 %v1123_v38, %v1122_v56  ;;  %v1131_v17 = vadd.f32 %v1130_v6, %v1129_v22 }
 0x404   :  { %v1038_v18 = vadd.f32 %v1036_v48, %v1003_v40  ;;  %v1039_v57 = vadd.f32 %v1037_v34, %v1004_v15  ;;  %v1073_v27 = vrot.slane %v1072_v16, 1  ;;  %v1080_v14 = vrot.slane %v1079_v21, 1 }
 0x405   :  { %v1059_v30 = vrot.slane %v1058_v45, 1  ;;  %v1066_v63 = vrot.slane %v1065_v23, 1  ;;  %v1125_v11 = vrot.slane %v1124_v46, 2  ;;  %v1132_v10 = vrot.slane %v1131_v17, 2 }
 0x406   :  { %v1082_v32 = vsel %vm434_vm10, %v1038_v18, 0.0  ;;  %v1089_v58 = vsel %vm434_vm10, %v1039_v57, 0.0  ;;  %v1158_v3 = vrot.slane %v1038_v18, 4  ;;  %v1159_v61 = vrot.slane %v1039_v57, 4 }
 0x407   :  { %v1060_v8 = vadd.f32 %v1059_v30, %v1058_v45  ;;  %v1067_v29 = vadd.f32 %v1066_v63, %v1065_v23  ;;  %v1083_v20 = vrot.slane %v1082_v32, 4  ;;  %v1090_v26 = vrot.slane %v1089_v58, 4 }
 0x408   :  { %v1162_v53 = vsel %vm434_vm10, %v1158_v3, 0.0  ;;  %v1169_v7 = vsel %vm434_vm10, %v1159_v61, 0.0  ;;  %v1145_v42 = vrot.slane %v1144_v49, 2  ;;  %v1152_v50 = vrot.slane %v1151_v54, 2 }
 0x409   :  { %v1176_v9 = vsel %vm571_vm11, %v1046_v36, %v1060_v8  ;;  %v1177_v4 = vsel %vm571_vm11, %v1053_v35, %v1067_v29  ;;  %v1084_v55 = vadd.f32 %v1083_v20, %v1082_v32  ;;  %v1091_v43 = vadd.f32 %v1090_v26, %v1089_v58 }
 0x40a   :  { %v1163_v5 = vrot.slane %v1162_v53, 4  ;;  %v1170_v31 = vrot.slane %v1169_v7, 4  ;;  %v1074_v25 = vadd.f32 %v1073_v27, %v1072_v16  ;;  %v1081_v37 = vadd.f32 %v1080_v14, %v1079_v21 }
 0x40b   :  { %v1126_v0 = vadd.f32 %v1125_v11, %v1124_v46  ;;  %v1133_v59 = vadd.f32 %v1132_v10, %v1131_v17  ;;  %v1085_v62 = vrot.slane %v1084_v55, 2  ;;  %v1092_v24 = vrot.slane %v1091_v43, 2  ;;  %v2355_v11 = vld [vmem:[#allocation7_spill] sm:$0xff] }
 0x40c   :  { %v1164_v60 = vadd.f32 %v1163_v5, %v1162_v53  ;;  %v1171_v1 = vadd.f32 %v1170_v31, %v1169_v7  ;;  %v1146_v28 = vadd.f32 %v1145_v42, %v1144_v49  ;;  %v1153_v44 = vadd.f32 %v1152_v50, %v1151_v54 }
 0x40d   :  { %v1178_v52 = vsel %vm2347_vm0, %v1176_v9, %v1074_v25  ;;  %v1179_v39 = vsel %vm2348_vm1, %v1177_v4, %v1081_v37  ;;  %v1086_v19 = vadd.f32 %v1085_v62, %v1084_v55  ;;  %v1093_v12 = vadd.f32 %v1092_v24, %v1091_v43  ;;  %v1269_v37 = vld [vmem:[%s2272_s2 + $0x8] sm:$0xff]  ;;  %s1393_s2 = smov [#allocation2]  }
 0x40e   :  { %v1165_v2 = vrot.slane %v1164_v60, 2  ;;  %v1172_v33 = vrot.slane %v1171_v1, 2  ;;  %v1107_v56 = vrot.slane %v2225_v51, 1  ;;  %v1114_v16 = vrot.slane %v2227_v47, 1  ;;  %s1241_s9 = sshll.u32 %s1393_s2, 4  ;;  %s1242_s9 = int_to_ptr.vmem [resolvable:$true] %s1241_s9 }
 0x40f   :  { %v1127_v21 = vrot.slane %v1126_v0, 1  ;;  %v1134_v22 = vrot.slane %v1133_v59, 1  ;;  %v1087_v13 = vrot.slane %v1086_v19, 1  ;;  %v1094_v41 = vrot.slane %v1093_v12, 1 }
 0x410   :  { %v1166_v38 = vadd.f32 %v1165_v2, %v1164_v60  ;;  %v1173_v6 = vadd.f32 %v1172_v33, %v1171_v1  ;;  %v1147_v49 = vrot.slane %v1146_v28, 1  ;;  %v1154_v54 = vrot.slane %v1153_v44, 1 }
 0x411   :  { %v1088_v40 = vadd.f32 %v1087_v13, %v1086_v19  ;;  %v1095_v15 = vadd.f32 %v1094_v41, %v1093_v12  ;;  %v1108_v45 = vadd.f32 %v1107_v56, %v2225_v51  ;;  %v1115_v23 = vadd.f32 %v1114_v16, %v2227_v47 }
 0x412   :  { %v1167_v48 = vrot.slane %v1166_v38, 1  ;;  %v1174_v34 = vrot.slane %v1173_v6, 1  ;;  %v1128_v46 = vadd.f32 %v1127_v21, %v1126_v0  ;;  %v1135_v17 = vadd.f32 %v1134_v22, %v1133_v59 }
 0x413   :  { %v1180_v36 = vsel %vm577_vm13, %v1178_v52, %v1088_v40  ;;  %v1181_v35 = vsel %vm577_vm13, %v1179_v39, %v1095_v15  ;;  %v1148_v18 = vadd.f32 %v1147_v49, %v1146_v28  ;;  %v1155_v57 = vadd.f32 %v1154_v54, %v1153_v44  ;;  %v1356_v44 = vld [vmem:[%s2270_s0] sm:$0xff]  ;;  %v1357_v39 = vld [vmem:[%s2270_s0 + $0x8] sm:$0xff] }
 0x414   :  { %v1182_v27 = vsel %vm434_vm10, %v1180_v36, %v1108_v45  ;;  %v1183_v14 = vsel %vm434_vm10, %v1181_v35, %v1115_v23  ;;  %v1168_v30 = vadd.f32 %v1167_v48, %v1166_v38  ;;  %v1175_v63 = vadd.f32 %v1174_v34, %v1173_v6 }
 0x415   :  { %v1184_v32 = vsel %vm2349_vm2, %v1182_v27, %v1128_v46  ;;  %v1185_v51 = vsel %vm2350_vm3, %v1183_v14, %v1135_v17  ;;  %vm2353_vm6 = vcmask 1046528   ;;  %v2356_v24 = vmov 1  }
 0x416   :  { %v1186_v47 = vsel %vm2351_vm4, %v1184_v32, %v1148_v18  ;;  %v1187_v58 = vsel %vm2352_vm5, %v1185_v51, %v1155_v57  ;;  %vm2354_vm7 = vmmov %vm2353_vm6  ;;  %v1230_v52 = vmul.f32 0.2, %v1356_v44  ;;  %v1231_v19 = vmul.f32 0.2, %v1357_v39 }
 0x417   :  { %v1188_v3 = vsel %vm2353_vm6, %v1186_v47, %v1168_v30  ;;  %v1189_v61 = vsel %vm2354_vm7, %v1187_v58, %v1175_v63 }
 0x418   :  { %v1190_v8 = vadd.f32 %v1189_v61, %v1188_v3 }
 0x41a   :  { %1191 = vadd.xlane.f32.xlu2 %v1190_v8 }
 0x48d   :  { %v1192_v29 = vpop.xlane.xlu2 %1191 }
 0x48e   :  { %v1193_v10 = vmul.f32 %v1192_v29, %v2355_v11 }
 0x490   :  { %v1194_v20 = vsub.f32 %v1188_v3, %v1193_v10  ;;  %v1195_v26 = vsub.f32 %v1189_v61, %v1193_v10 }
 0x492   :  { %v1196_v53 = vmul.f32 %v1194_v20, %v1194_v20  ;;  %v1197_v7 = vmul.f32 %v1195_v26, %v1195_v26 }
 0x494   :  { %v1198_v42 = vadd.f32 %v1197_v7, %v1196_v53 }
 0x496   :  { %1199 = vadd.xlane.f32.xlu0 %v1198_v42 }
 0x509   :  { %v1200_v50 = vpop.xlane.xlu0 %1199 }
 0x50a   :  { %v1201_v9 = vmul.f32 %v1200_v50, %v2355_v11 }
 0x50c   :  { %v1204_v4 = vadd.f32 1e-05, %v1201_v9 }
 0x50e   :  { %1354 = vrsqrt.f32 %v1204_v4  ;;  %vm1211_vm9 = vweird.f32 %v1204_v4 }
 0x514   :  { %v1355_v55 = vpop.eup %1354 }
 0x515   :  { %v1206_v43 = vmul.f32 %v1355_v55, %v1204_v4  ;;  %vm1212_vm8 = vweird.f32 %v1355_v55 }
 0x516   :  { %vm1213_vm10 = vmor %vm1211_vm9, %vm1212_vm8 }
 0x517   :  { %v1207_v5 = vmul.f32 %v1355_v55, %v1206_v43 }
 0x519   :  { %v1208_v31 = vmul.f32 0.5, %v1207_v5 }
 0x51b   :  { %v1209_v25 = vsub.f32 1.5, %v1208_v31 }
 0x51d   :  { %v1210_v0 = vmul.f32 %v1355_v55, %v1209_v25 }
 0x51f   :  { %v1214_v59 = vsel %vm1213_vm10, %v1355_v55, %v1210_v0 }
 0x520   :  { %v1215_v62 = vmul.f32 %v1269_v37, %v1214_v59 }
 0x522   :  { %1218 = vperm.xlu1 %1347, %v1215_v62  }
 0x52a   :  { %1348 = vset.pattern.permute.xlu1 %v2356_v24 }
 0x52b   :  { %1225 = vperm.xlu1 %1348, %v1269_v37  }
 0x594   :  { %v1219_v60 = vpop.permute.xlu1 %1218 }
 0x595   :  { %v1221_v1 = vmul.f32 %v1219_v60, %v1194_v20  ;;  %v1222_v28 = vmul.f32 %v1219_v60, %v1195_v26 }
 0x59d   :  { %v1226_v12 = vpop.permute.xlu1 %1225 }
 0x59e   :  { %v1228_v2 = vadd.f32 %v1226_v12, %v1221_v1  ;;  %v1229_v33 = vadd.f32 %v1226_v12, %v1222_v28 }
 0x5a0   :  { %v1232_v56 = vadd.f32 %v1230_v52, %v1228_v2  ;;  %v1233_v16 = vadd.f32 %v1231_v19, %v1229_v33 }
 0x5a2   :  { %1234 = vst [vmem:[#allocation2] sm:$0xff] %v1232_v56 }
 0x5a3   :  { %1235 = vst [vmem:[#allocation2 + $0x8] sm:$0xff] %v1233_v16 }
 0x5a4   :  { %1246 = dma.vmem_to_hbm [thread:$0]  %s1242_s9, 256, %s1244_s12, [#allocation3]  }
 0x5a5   :  { %1382 = dma.done.wait [#allocation3], 256  }
 0x5a6   :  { %1383 = vsyncadd [#allocation3], 4294967040 }
 0x5a7   :  { %1251 = vsyncpa [#allocation3], 1 }

</bundles_post_ra>
